<compile_context>
chip_gen: v5e
topology: v5e:2x2
jax: 0.10.0
libtpu: 0.0.40
codegen_flags: <defaults>
</compile_context>

<pallas_src>
import functools

import jax
import jax.numpy as jnp
from jax.experimental import pallas as pl
from jax.experimental.pallas import tpu as pltpu


def koopman_kernel(x0_ref, wa_ref, b1_ref, w2b_ref, b2_ref, out_ref, *, T):
    B, D = x0_ref.shape
    wa = wa_ref[...]                                   # (D, 2D) = [W1.T | P]
    w2b = w2b_ref[...]                                 # (D, 2D) folded W2
    b1b = jnp.broadcast_to(b1_ref[...], (B, D))        # hoisted out of loop
    b2b = jnp.broadcast_to(b2_ref[...], (B, 2 * D))    # hoisted out of loop

    y = x0_ref[...]
    # Fully unrolled: static trip count, static store addresses.
    for t in range(T):
        # One wide matmul: [h_pre | y_sw]
        z = jnp.dot(y, wa, preferred_element_type=jnp.float32)          # (B, 2D)
        h = jnp.tanh(z[:, :D] + b1b)
        # One wide matmul: [dt*mu_dup | signed dt*omega_dup]
        p = jnp.dot(h, w2b, preferred_element_type=jnp.float32) + b2b   # (B, 2D)
        e = jnp.exp(p[:, :D])          # exp(dt*mu), duplicated per 2x2 pair
        c = jnp.cos(p[:, D:]) * e      # cos(dt*omega)*exp   (cos is even)
        s = jnp.sin(p[:, D:]) * e      # (+/-)sin(dt*omega)*exp, sign pre-folded
        y = c * y + s * z[:, D:]       # z[:, D:] is the pair-swapped y
        out_ref[:, t * D:(t + 1) * D] = y


def koopman_forward(x, T, params, delta_t):
    """x: (B, T_in, D) float32. Returns Y: (B, T, D) float32."""
    w1, b1, w2, b2 = params
    B, _, D = x.shape
    T = int(T)
    x0 = x[:, 0, :].astype(jnp.float32)
    dt = jnp.float32(delta_t)

    idx = jnp.arange(D)
    # pair-swap permutation: (v @ P)[:, j] = v[:, j ^ 1]
    P = jnp.zeros((D, D), jnp.float32).at[idx ^ 1, idx].set(1.0)
    wa = jnp.concatenate([w1.T.astype(jnp.float32), P], axis=1)          # (D, 2D)

    # Fold pair-duplication, delta_t scaling and the 2x2 rotation sign into
    # the second-layer weights / bias (computed once in the wrapper).
    mu_cols = (idx // 2) * 2            # W2 column producing mu_{j//2}
    om_cols = mu_cols + 1               # W2 column producing omega_{j//2}
    sgn = jnp.where(idx % 2 == 0, jnp.float32(-1.0), jnp.float32(1.0))
    w2t = w2.T.astype(jnp.float32)
    w2b = jnp.concatenate(
        [dt * w2t[:, mu_cols], dt * w2t[:, om_cols] * sgn[None, :]],
        axis=1)                                                           # (D, 2D)
    b2f = b2.astype(jnp.float32)
    b2b = jnp.concatenate(
        [dt * b2f[mu_cols], dt * b2f[om_cols] * sgn]).reshape(1, 2 * D)
    b1r = b1.astype(jnp.float32).reshape(1, D)

    # Batch tiling: trivial here (B=2 -> one tile); for large B use 8-row
    # tiles so the "parallel" axis is split across TensorCores on v7x.
    B_tile = 8 if B % 8 == 0 else B
    grid = (pl.cdiv(B, B_tile),)

    kernel = functools.partial(koopman_kernel, T=T)
    out = pl.pallas_call(
        kernel,
        out_shape=jax.ShapeDtypeStruct((B, T * D), jnp.float32),
        grid_spec=pltpu.PrefetchScalarGridSpec(
            num_scalar_prefetch=0,
            grid=grid,
            in_specs=[
                pl.BlockSpec((B_tile, D), lambda b: (b, 0)),     # y0
                pl.BlockSpec((D, 2 * D), lambda b: (0, 0)),      # [W1.T | P]
                pl.BlockSpec((1, D), lambda b: (0, 0)),          # b1
                pl.BlockSpec((D, 2 * D), lambda b: (0, 0)),      # folded W2
                pl.BlockSpec((1, 2 * D), lambda b: (0, 0)),      # folded b2
            ],
            out_specs=pl.BlockSpec((B_tile, T * D), lambda b: (b, 0)),
        ),
        compiler_params=pltpu.CompilerParams(
            dimension_semantics=("parallel",)),
    )(x0, wa, b1r, w2b, b2b)
    # (B, T*D) -> (B, T, D): contiguous reshape, no transpose through HBM.
    return out.reshape(B, T, D)


def koopman_reference(x, T, params, delta_t):
    """Pure-JAX port of the PyTorch forward (builds K explicitly)."""
    w1, b1, w2, b2 = params
    B, _, D = x.shape
    ne = D // 2
    y = x[:, 0, :]
    ys = []
    for _ in range(T):
        p = jnp.tanh(y @ w1.T + b1) @ w2.T + b2
        p = p.reshape(B, ne, 2)
        mu, omega = p[..., 0], p[..., 1]
        e = jnp.exp(delta_t * mu)
        c = jnp.cos(delta_t * omega)
        s = jnp.sin(delta_t * omega)
        K = jnp.zeros((B, D, D), jnp.float32)
        for i in range(0, D, 2):
            j = i // 2
            K = K.at[:, i, i].set(c[:, j] * e[:, j])
            K = K.at[:, i, i + 1].set(-s[:, j] * e[:, j])
            K = K.at[:, i + 1, i].set(s[:, j] * e[:, j])
            K = K.at[:, i + 1, i + 1].set(c[:, j] * e[:, j])
        y = jnp.einsum('bij,bj->bi', K, y)
        ys.append(y)
    return jnp.stack(ys, axis=1)


if __name__ == "__main__":
    koopman_dim = 32          # D (even); num_eigenvalues = 16
    delta_t = 0.1
    B, T_in, T = 2, 8, 8

    key = jax.random.PRNGKey(0)
    kx, k1, k2, k3, k4 = jax.random.split(key, 5)
    scale = 1.0 / jnp.sqrt(koopman_dim)
    w1 = jax.random.uniform(k1, (koopman_dim, koopman_dim), jnp.float32,
                            -scale, scale)
    b1 = jax.random.uniform(k2, (koopman_dim,), jnp.float32, -scale, scale)
    w2 = jax.random.uniform(k3, (koopman_dim, koopman_dim), jnp.float32,
                            -scale, scale)
    b2 = jax.random.uniform(k4, (koopman_dim,), jnp.float32, -scale, scale)
    params = (w1, b1, w2, b2)

    x = jax.random.normal(kx, (B, T_in, koopman_dim), jnp.float32)

    y_kernel = jax.block_until_ready(koopman_forward(x, T, params, delta_t))
    y_ref = jax.block_until_ready(koopman_reference(x, T, params, delta_t))

    assert y_kernel.shape == (B, T, koopman_dim)
    assert jnp.allclose(y_kernel, y_ref, rtol=1e-4, atol=1e-4), (
        float(jnp.max(jnp.abs(y_kernel - y_ref))))
    print("KERNEL_OK")
</pallas_src>

<mosaic_0001>
module attributes {stable_mosaic.version = 11 : i64} {
  func.func @koopman_kernel(%arg0: i32, %arg1: memref<2x32xf32, #tpu.memory_space<vmem>>, %arg2: memref<32x64xf32, #tpu.memory_space<vmem>>, %arg3: memref<1x32xf32, #tpu.memory_space<vmem>>, %arg4: memref<32x64xf32, #tpu.memory_space<vmem>>, %arg5: memref<1x64xf32, #tpu.memory_space<vmem>>, %arg6: memref<2x256xf32, #tpu.memory_space<vmem>>) attributes {dimension_semantics = [#tpu.dimension_semantics<parallel>], iteration_bounds = array<i64: 1>, scalar_prefetch = 0 : i64, scratch_operands = 0 : i64, tpu.core_type = #tpu.core_type<tc>, window_params = [{transform_indices = @transform_0, window_bounds = array<i64: 2, 32>}, {pipeline_mode = #tpu.pipeline_mode<synchronous>, transform_indices = @transform_1, window_bounds = array<i64: 32, 64>}, {pipeline_mode = #tpu.pipeline_mode<synchronous>, transform_indices = @transform_2, window_bounds = array<i64: 1, 32>}, {pipeline_mode = #tpu.pipeline_mode<synchronous>, transform_indices = @transform_3, window_bounds = array<i64: 32, 64>}, {pipeline_mode = #tpu.pipeline_mode<synchronous>, transform_indices = @transform_4, window_bounds = array<i64: 1, 64>}, {transform_indices = @transform_5, window_bounds = array<i64: 2, 256>}]} {
    %c0 = arith.constant 0 : index
    %c0_0 = arith.constant 0 : index
    %0 = vector.load %arg2[%c0, %c0_0] : memref<32x64xf32, #tpu.memory_space<vmem>>, vector<32x64xf32>
    %c0_1 = arith.constant 0 : index
    %c0_2 = arith.constant 0 : index
    %1 = vector.load %arg4[%c0_1, %c0_2] : memref<32x64xf32, #tpu.memory_space<vmem>>, vector<32x64xf32>
    %c0_3 = arith.constant 0 : index
    %c0_4 = arith.constant 0 : index
    %2 = vector.load %arg3[%c0_3, %c0_4] : memref<1x32xf32, #tpu.memory_space<vmem>>, vector<1x32xf32>
    %3 = vector.shape_cast %2 : vector<1x32xf32> to vector<1x32xf32>
    %4 = vector.broadcast %3 : vector<1x32xf32> to vector<2x32xf32>
    %c0_5 = arith.constant 0 : index
    %c0_6 = arith.constant 0 : index
    %5 = vector.load %arg5[%c0_5, %c0_6] : memref<1x64xf32, #tpu.memory_space<vmem>>, vector<1x64xf32>
    %6 = vector.shape_cast %5 : vector<1x64xf32> to vector<1x64xf32>
    %7 = vector.broadcast %6 : vector<1x64xf32> to vector<2x64xf32>
    %c0_7 = arith.constant 0 : index
    %c0_8 = arith.constant 0 : index
    %8 = vector.load %arg1[%c0_7, %c0_8] : memref<2x32xf32, #tpu.memory_space<vmem>>, vector<2x32xf32>
    %cst = arith.constant dense<0.000000e+00> : vector<2x64xf32>
    %9 = tpu.matmul %8, %0, %cst {dimension_numbers = #tpu.dot_dimension_numbers<[1], [0], [0], [1], [0, 0, 1, 1], [], []>} : vector<2x32xf32>, vector<32x64xf32>, vector<2x64xf32> -> vector<2x64xf32>
    %10 = vector.extract_strided_slice %9 {offsets = [0, 0], sizes = [2, 32], strides = [1, 1]} : vector<2x64xf32> to vector<2x32xf32>
    %11 = arith.addf %10, %4 : vector<2x32xf32>
    %12 = math.tanh %11 : vector<2x32xf32>
    %cst_9 = arith.constant dense<0.000000e+00> : vector<2x64xf32>
    %13 = tpu.matmul %12, %1, %cst_9 {dimension_numbers = #tpu.dot_dimension_numbers<[1], [0], [0], [1], [0, 0, 1, 1], [], []>} : vector<2x32xf32>, vector<32x64xf32>, vector<2x64xf32> -> vector<2x64xf32>
    %14 = arith.addf %13, %7 : vector<2x64xf32>
    %15 = vector.extract_strided_slice %14 {offsets = [0, 0], sizes = [2, 32], strides = [1, 1]} : vector<2x64xf32> to vector<2x32xf32>
    %16 = math.exp %15 : vector<2x32xf32>
    %17 = vector.extract_strided_slice %14 {offsets = [0, 32], sizes = [2, 32], strides = [1, 1]} : vector<2x64xf32> to vector<2x32xf32>
    %18 = math.cos %17 : vector<2x32xf32>
    %19 = arith.mulf %18, %16 : vector<2x32xf32>
    %20 = vector.extract_strided_slice %14 {offsets = [0, 32], sizes = [2, 32], strides = [1, 1]} : vector<2x64xf32> to vector<2x32xf32>
    %21 = math.sin %20 : vector<2x32xf32>
    %22 = arith.mulf %21, %16 : vector<2x32xf32>
    %23 = arith.mulf %19, %8 : vector<2x32xf32>
    %24 = vector.extract_strided_slice %9 {offsets = [0, 32], sizes = [2, 32], strides = [1, 1]} : vector<2x64xf32> to vector<2x32xf32>
    %25 = arith.mulf %22, %24 : vector<2x32xf32>
    %26 = arith.addf %23, %25 : vector<2x32xf32>
    %c0_10 = arith.constant 0 : index
    %c0_11 = arith.constant 0 : index
    %27 = vector.load %arg6[%c0_10, %c0_11] : memref<2x256xf32, #tpu.memory_space<vmem>>, vector<2x32xf32>
    tpu.vector_store %arg6[%c0_10, %c0_11], %26 {strides = array<i32>} : memref<2x256xf32, #tpu.memory_space<vmem>>, vector<2x32xf32>,
    %cst_12 = arith.constant dense<0.000000e+00> : vector<2x64xf32>
    %28 = tpu.matmul %26, %0, %cst_12 {dimension_numbers = #tpu.dot_dimension_numbers<[1], [0], [0], [1], [0, 0, 1, 1], [], []>} : vector<2x32xf32>, vector<32x64xf32>, vector<2x64xf32> -> vector<2x64xf32>
    %29 = vector.extract_strided_slice %28 {offsets = [0, 0], sizes = [2, 32], strides = [1, 1]} : vector<2x64xf32> to vector<2x32xf32>
    %30 = arith.addf %29, %4 : vector<2x32xf32>
    %31 = math.tanh %30 : vector<2x32xf32>
    %cst_13 = arith.constant dense<0.000000e+00> : vector<2x64xf32>
    %32 = tpu.matmul %31, %1, %cst_13 {dimension_numbers = #tpu.dot_dimension_numbers<[1], [0], [0], [1], [0, 0, 1, 1], [], []>} : vector<2x32xf32>, vector<32x64xf32>, vector<2x64xf32> -> vector<2x64xf32>
    %33 = arith.addf %32, %7 : vector<2x64xf32>
    %34 = vector.extract_strided_slice %33 {offsets = [0, 0], sizes = [2, 32], strides = [1, 1]} : vector<2x64xf32> to vector<2x32xf32>
    %35 = math.exp %34 : vector<2x32xf32>
    %36 = vector.extract_strided_slice %33 {offsets = [0, 32], sizes = [2, 32], strides = [1, 1]} : vector<2x64xf32> to vector<2x32xf32>
    %37 = math.cos %36 : vector<2x32xf32>
    %38 = arith.mulf %37, %35 : vector<2x32xf32>
    %39 = vector.extract_strided_slice %33 {offsets = [0, 32], sizes = [2, 32], strides = [1, 1]} : vector<2x64xf32> to vector<2x32xf32>
    %40 = math.sin %39 : vector<2x32xf32>
    %41 = arith.mulf %40, %35 : vector<2x32xf32>
    %42 = arith.mulf %38, %26 : vector<2x32xf32>
    %43 = vector.extract_strided_slice %28 {offsets = [0, 32], sizes = [2, 32], strides = [1, 1]} : vector<2x64xf32> to vector<2x32xf32>
    %44 = arith.mulf %41, %43 : vector<2x32xf32>
    %45 = arith.addf %42, %44 : vector<2x32xf32>
    %c0_14 = arith.constant 0 : index
    %c32 = arith.constant 32 : index
    %46 = vector.load %arg6[%c0_14, %c32] : memref<2x256xf32, #tpu.memory_space<vmem>>, vector<2x32xf32>
    tpu.vector_store %arg6[%c0_14, %c32], %45 {strides = array<i32>} : memref<2x256xf32, #tpu.memory_space<vmem>>, vector<2x32xf32>,
    %cst_15 = arith.constant dense<0.000000e+00> : vector<2x64xf32>
    %47 = tpu.matmul %45, %0, %cst_15 {dimension_numbers = #tpu.dot_dimension_numbers<[1], [0], [0], [1], [0, 0, 1, 1], [], []>} : vector<2x32xf32>, vector<32x64xf32>, vector<2x64xf32> -> vector<2x64xf32>
    %48 = vector.extract_strided_slice %47 {offsets = [0, 0], sizes = [2, 32], strides = [1, 1]} : vector<2x64xf32> to vector<2x32xf32>
    %49 = arith.addf %48, %4 : vector<2x32xf32>
    %50 = math.tanh %49 : vector<2x32xf32>
    %cst_16 = arith.constant dense<0.000000e+00> : vector<2x64xf32>
    %51 = tpu.matmul %50, %1, %cst_16 {dimension_numbers = #tpu.dot_dimension_numbers<[1], [0], [0], [1], [0, 0, 1, 1], [], []>} : vector<2x32xf32>, vector<32x64xf32>, vector<2x64xf32> -> vector<2x64xf32>
    %52 = arith.addf %51, %7 : vector<2x64xf32>
    %53 = vector.extract_strided_slice %52 {offsets = [0, 0], sizes = [2, 32], strides = [1, 1]} : vector<2x64xf32> to vector<2x32xf32>
    %54 = math.exp %53 : vector<2x32xf32>
    %55 = vector.extract_strided_slice %52 {offsets = [0, 32], sizes = [2, 32], strides = [1, 1]} : vector<2x64xf32> to vector<2x32xf32>
    %56 = math.cos %55 : vector<2x32xf32>
    %57 = arith.mulf %56, %54 : vector<2x32xf32>
    %58 = vector.extract_strided_slice %52 {offsets = [0, 32], sizes = [2, 32], strides = [1, 1]} : vector<2x64xf32> to vector<2x32xf32>
    %59 = math.sin %58 : vector<2x32xf32>
    %60 = arith.mulf %59, %54 : vector<2x32xf32>
    %61 = arith.mulf %57, %45 : vector<2x32xf32>
    %62 = vector.extract_strided_slice %47 {offsets = [0, 32], sizes = [2, 32], strides = [1, 1]} : vector<2x64xf32> to vector<2x32xf32>
    %63 = arith.mulf %60, %62 : vector<2x32xf32>
    %64 = arith.addf %61, %63 : vector<2x32xf32>
    %c0_17 = arith.constant 0 : index
    %c64 = arith.constant 64 : index
    %65 = vector.load %arg6[%c0_17, %c64] : memref<2x256xf32, #tpu.memory_space<vmem>>, vector<2x32xf32>
    tpu.vector_store %arg6[%c0_17, %c64], %64 {strides = array<i32>} : memref<2x256xf32, #tpu.memory_space<vmem>>, vector<2x32xf32>,
    %cst_18 = arith.constant dense<0.000000e+00> : vector<2x64xf32>
    %66 = tpu.matmul %64, %0, %cst_18 {dimension_numbers = #tpu.dot_dimension_numbers<[1], [0], [0], [1], [0, 0, 1, 1], [], []>} : vector<2x32xf32>, vector<32x64xf32>, vector<2x64xf32> -> vector<2x64xf32>
    %67 = vector.extract_strided_slice %66 {offsets = [0, 0], sizes = [2, 32], strides = [1, 1]} : vector<2x64xf32> to vector<2x32xf32>
    %68 = arith.addf %67, %4 : vector<2x32xf32>
    %69 = math.tanh %68 : vector<2x32xf32>
    %cst_19 = arith.constant dense<0.000000e+00> : vector<2x64xf32>
    %70 = tpu.matmul %69, %1, %cst_19 {dimension_numbers = #tpu.dot_dimension_numbers<[1], [0], [0], [1], [0, 0, 1, 1], [], []>} : vector<2x32xf32>, vector<32x64xf32>, vector<2x64xf32> -> vector<2x64xf32>
    %71 = arith.addf %70, %7 : vector<2x64xf32>
    %72 = vector.extract_strided_slice %71 {offsets = [0, 0], sizes = [2, 32], strides = [1, 1]} : vector<2x64xf32> to vector<2x32xf32>
    %73 = math.exp %72 : vector<2x32xf32>
    %74 = vector.extract_strided_slice %71 {offsets = [0, 32], sizes = [2, 32], strides = [1, 1]} : vector<2x64xf32> to vector<2x32xf32>
    %75 = math.cos %74 : vector<2x32xf32>
    %76 = arith.mulf %75, %73 : vector<2x32xf32>
    %77 = vector.extract_strided_slice %71 {offsets = [0, 32], sizes = [2, 32], strides = [1, 1]} : vector<2x64xf32> to vector<2x32xf32>
    %78 = math.sin %77 : vector<2x32xf32>
    %79 = arith.mulf %78, %73 : vector<2x32xf32>
    %80 = arith.mulf %76, %64 : vector<2x32xf32>
    %81 = vector.extract_strided_slice %66 {offsets = [0, 32], sizes = [2, 32], strides = [1, 1]} : vector<2x64xf32> to vector<2x32xf32>
    %82 = arith.mulf %79, %81 : vector<2x32xf32>
    %83 = arith.addf %80, %82 : vector<2x32xf32>
    %c0_20 = arith.constant 0 : index
    %c96 = arith.constant 96 : index
    %84 = vector.load %arg6[%c0_20, %c96] : memref<2x256xf32, #tpu.memory_space<vmem>>, vector<2x32xf32>
    tpu.vector_store %arg6[%c0_20, %c96], %83 {strides = array<i32>} : memref<2x256xf32, #tpu.memory_space<vmem>>, vector<2x32xf32>,
    %cst_21 = arith.constant dense<0.000000e+00> : vector<2x64xf32>
    %85 = tpu.matmul %83, %0, %cst_21 {dimension_numbers = #tpu.dot_dimension_numbers<[1], [0], [0], [1], [0, 0, 1, 1], [], []>} : vector<2x32xf32>, vector<32x64xf32>, vector<2x64xf32> -> vector<2x64xf32>
    %86 = vector.extract_strided_slice %85 {offsets = [0, 0], sizes = [2, 32], strides = [1, 1]} : vector<2x64xf32> to vector<2x32xf32>
    %87 = arith.addf %86, %4 : vector<2x32xf32>
    %88 = math.tanh %87 : vector<2x32xf32>
    %cst_22 = arith.constant dense<0.000000e+00> : vector<2x64xf32>
    %89 = tpu.matmul %88, %1, %cst_22 {dimension_numbers = #tpu.dot_dimension_numbers<[1], [0], [0], [1], [0, 0, 1, 1], [], []>} : vector<2x32xf32>, vector<32x64xf32>, vector<2x64xf32> -> vector<2x64xf32>
    %90 = arith.addf %89, %7 : vector<2x64xf32>
    %91 = vector.extract_strided_slice %90 {offsets = [0, 0], sizes = [2, 32], strides = [1, 1]} : vector<2x64xf32> to vector<2x32xf32>
    %92 = math.exp %91 : vector<2x32xf32>
    %93 = vector.extract_strided_slice %90 {offsets = [0, 32], sizes = [2, 32], strides = [1, 1]} : vector<2x64xf32> to vector<2x32xf32>
    %94 = math.cos %93 : vector<2x32xf32>
    %95 = arith.mulf %94, %92 : vector<2x32xf32>
    %96 = vector.extract_strided_slice %90 {offsets = [0, 32], sizes = [2, 32], strides = [1, 1]} : vector<2x64xf32> to vector<2x32xf32>
    %97 = math.sin %96 : vector<2x32xf32>
    %98 = arith.mulf %97, %92 : vector<2x32xf32>
    %99 = arith.mulf %95, %83 : vector<2x32xf32>
    %100 = vector.extract_strided_slice %85 {offsets = [0, 32], sizes = [2, 32], strides = [1, 1]} : vector<2x64xf32> to vector<2x32xf32>
    %101 = arith.mulf %98, %100 : vector<2x32xf32>
    %102 = arith.addf %99, %101 : vector<2x32xf32>
    %c0_23 = arith.constant 0 : index
    %c128 = arith.constant 128 : index
    %103 = vector.load %arg6[%c0_23, %c128] : memref<2x256xf32, #tpu.memory_space<vmem>>, vector<2x32xf32>
    tpu.vector_store %arg6[%c0_23, %c128], %102 {strides = array<i32>} : memref<2x256xf32, #tpu.memory_space<vmem>>, vector<2x32xf32>,
    %cst_24 = arith.constant dense<0.000000e+00> : vector<2x64xf32>
    %104 = tpu.matmul %102, %0, %cst_24 {dimension_numbers = #tpu.dot_dimension_numbers<[1], [0], [0], [1], [0, 0, 1, 1], [], []>} : vector<2x32xf32>, vector<32x64xf32>, vector<2x64xf32> -> vector<2x64xf32>
    %105 = vector.extract_strided_slice %104 {offsets = [0, 0], sizes = [2, 32], strides = [1, 1]} : vector<2x64xf32> to vector<2x32xf32>
    %106 = arith.addf %105, %4 : vector<2x32xf32>
    %107 = math.tanh %106 : vector<2x32xf32>
    %cst_25 = arith.constant dense<0.000000e+00> : vector<2x64xf32>
    %108 = tpu.matmul %107, %1, %cst_25 {dimension_numbers = #tpu.dot_dimension_numbers<[1], [0], [0], [1], [0, 0, 1, 1], [], []>} : vector<2x32xf32>, vector<32x64xf32>, vector<2x64xf32> -> vector<2x64xf32>
    %109 = arith.addf %108, %7 : vector<2x64xf32>
    %110 = vector.extract_strided_slice %109 {offsets = [0, 0], sizes = [2, 32], strides = [1, 1]} : vector<2x64xf32> to vector<2x32xf32>
    %111 = math.exp %110 : vector<2x32xf32>
    %112 = vector.extract_strided_slice %109 {offsets = [0, 32], sizes = [2, 32], strides = [1, 1]} : vector<2x64xf32> to vector<2x32xf32>
    %113 = math.cos %112 : vector<2x32xf32>
    %114 = arith.mulf %113, %111 : vector<2x32xf32>
    %115 = vector.extract_strided_slice %109 {offsets = [0, 32], sizes = [2, 32], strides = [1, 1]} : vector<2x64xf32> to vector<2x32xf32>
    %116 = math.sin %115 : vector<2x32xf32>
    %117 = arith.mulf %116, %111 : vector<2x32xf32>
    %118 = arith.mulf %114, %102 : vector<2x32xf32>
    %119 = vector.extract_strided_slice %104 {offsets = [0, 32], sizes = [2, 32], strides = [1, 1]} : vector<2x64xf32> to vector<2x32xf32>
    %120 = arith.mulf %117, %119 : vector<2x32xf32>
    %121 = arith.addf %118, %120 : vector<2x32xf32>
    %c0_26 = arith.constant 0 : index
    %c160 = arith.constant 160 : index
    %122 = vector.load %arg6[%c0_26, %c160] : memref<2x256xf32, #tpu.memory_space<vmem>>, vector<2x32xf32>
    tpu.vector_store %arg6[%c0_26, %c160], %121 {strides = array<i32>} : memref<2x256xf32, #tpu.memory_space<vmem>>, vector<2x32xf32>,
    %cst_27 = arith.constant dense<0.000000e+00> : vector<2x64xf32>
    %123 = tpu.matmul %121, %0, %cst_27 {dimension_numbers = #tpu.dot_dimension_numbers<[1], [0], [0], [1], [0, 0, 1, 1], [], []>} : vector<2x32xf32>, vector<32x64xf32>, vector<2x64xf32> -> vector<2x64xf32>
    %124 = vector.extract_strided_slice %123 {offsets = [0, 0], sizes = [2, 32], strides = [1, 1]} : vector<2x64xf32> to vector<2x32xf32>
    %125 = arith.addf %124, %4 : vector<2x32xf32>
    %126 = math.tanh %125 : vector<2x32xf32>
    %cst_28 = arith.constant dense<0.000000e+00> : vector<2x64xf32>
    %127 = tpu.matmul %126, %1, %cst_28 {dimension_numbers = #tpu.dot_dimension_numbers<[1], [0], [0], [1], [0, 0, 1, 1], [], []>} : vector<2x32xf32>, vector<32x64xf32>, vector<2x64xf32> -> vector<2x64xf32>
    %128 = arith.addf %127, %7 : vector<2x64xf32>
    %129 = vector.extract_strided_slice %128 {offsets = [0, 0], sizes = [2, 32], strides = [1, 1]} : vector<2x64xf32> to vector<2x32xf32>
    %130 = math.exp %129 : vector<2x32xf32>
    %131 = vector.extract_strided_slice %128 {offsets = [0, 32], sizes = [2, 32], strides = [1, 1]} : vector<2x64xf32> to vector<2x32xf32>
    %132 = math.cos %131 : vector<2x32xf32>
    %133 = arith.mulf %132, %130 : vector<2x32xf32>
    %134 = vector.extract_strided_slice %128 {offsets = [0, 32], sizes = [2, 32], strides = [1, 1]} : vector<2x64xf32> to vector<2x32xf32>
    %135 = math.sin %134 : vector<2x32xf32>
    %136 = arith.mulf %135, %130 : vector<2x32xf32>
    %137 = arith.mulf %133, %121 : vector<2x32xf32>
    %138 = vector.extract_strided_slice %123 {offsets = [0, 32], sizes = [2, 32], strides = [1, 1]} : vector<2x64xf32> to vector<2x32xf32>
    %139 = arith.mulf %136, %138 : vector<2x32xf32>
    %140 = arith.addf %137, %139 : vector<2x32xf32>
    %c0_29 = arith.constant 0 : index
    %c192 = arith.constant 192 : index
    %141 = vector.load %arg6[%c0_29, %c192] : memref<2x256xf32, #tpu.memory_space<vmem>>, vector<2x32xf32>
    tpu.vector_store %arg6[%c0_29, %c192], %140 {strides = array<i32>} : memref<2x256xf32, #tpu.memory_space<vmem>>, vector<2x32xf32>,
    %cst_30 = arith.constant dense<0.000000e+00> : vector<2x64xf32>
    %142 = tpu.matmul %140, %0, %cst_30 {dimension_numbers = #tpu.dot_dimension_numbers<[1], [0], [0], [1], [0, 0, 1, 1], [], []>} : vector<2x32xf32>, vector<32x64xf32>, vector<2x64xf32> -> vector<2x64xf32>
    %143 = vector.extract_strided_slice %142 {offsets = [0, 0], sizes = [2, 32], strides = [1, 1]} : vector<2x64xf32> to vector<2x32xf32>
    %144 = arith.addf %143, %4 : vector<2x32xf32>
    %145 = math.tanh %144 : vector<2x32xf32>
    %cst_31 = arith.constant dense<0.000000e+00> : vector<2x64xf32>
    %146 = tpu.matmul %145, %1, %cst_31 {dimension_numbers = #tpu.dot_dimension_numbers<[1], [0], [0], [1], [0, 0, 1, 1], [], []>} : vector<2x32xf32>, vector<32x64xf32>, vector<2x64xf32> -> vector<2x64xf32>
    %147 = arith.addf %146, %7 : vector<2x64xf32>
    %148 = vector.extract_strided_slice %147 {offsets = [0, 0], sizes = [2, 32], strides = [1, 1]} : vector<2x64xf32> to vector<2x32xf32>
    %149 = math.exp %148 : vector<2x32xf32>
    %150 = vector.extract_strided_slice %147 {offsets = [0, 32], sizes = [2, 32], strides = [1, 1]} : vector<2x64xf32> to vector<2x32xf32>
    %151 = math.cos %150 : vector<2x32xf32>
    %152 = arith.mulf %151, %149 : vector<2x32xf32>
    %153 = vector.extract_strided_slice %147 {offsets = [0, 32], sizes = [2, 32], strides = [1, 1]} : vector<2x64xf32> to vector<2x32xf32>
    %154 = math.sin %153 : vector<2x32xf32>
    %155 = arith.mulf %154, %149 : vector<2x32xf32>
    %156 = arith.mulf %152, %140 : vector<2x32xf32>
    %157 = vector.extract_strided_slice %142 {offsets = [0, 32], sizes = [2, 32], strides = [1, 1]} : vector<2x64xf32> to vector<2x32xf32>
    %158 = arith.mulf %155, %157 : vector<2x32xf32>
    %159 = arith.addf %156, %158 : vector<2x32xf32>
    %c0_32 = arith.constant 0 : index
    %c224 = arith.constant 224 : index
    %160 = vector.load %arg6[%c0_32, %c224] : memref<2x256xf32, #tpu.memory_space<vmem>>, vector<2x32xf32>
    tpu.vector_store %arg6[%c0_32, %c224], %159 {strides = array<i32>} : memref<2x256xf32, #tpu.memory_space<vmem>>, vector<2x32xf32>,
    return
  }
  func.func @transform_0(%arg0: i32) -> (i32, i32) {
    %c0_i32 = arith.constant 0 : i32
    %c0_i32_0 = arith.constant 0 : i32
    return %arg0, %c0_i32 : i32, i32
  }
  func.func @transform_1(%arg0: i32) -> (i32, i32) {
    %c0_i32 = arith.constant 0 : i32
    %c0_i32_0 = arith.constant 0 : i32
    %c0_i32_1 = arith.constant 0 : i32
    return %c0_i32, %c0_i32_0 : i32, i32
  }
  func.func @transform_2(%arg0: i32) -> (i32, i32) {
    %c0_i32 = arith.constant 0 : i32
    %c0_i32_0 = arith.constant 0 : i32
    %c0_i32_1 = arith.constant 0 : i32
    return %c0_i32, %c0_i32_0 : i32, i32
  }
  func.func @transform_3(%arg0: i32) -> (i32, i32) {
    %c0_i32 = arith.constant 0 : i32
    %c0_i32_0 = arith.constant 0 : i32
    %c0_i32_1 = arith.constant 0 : i32
    return %c0_i32, %c0_i32_0 : i32, i32
  }
  func.func @transform_4(%arg0: i32) -> (i32, i32) {
    %c0_i32 = arith.constant 0 : i32
    %c0_i32_0 = arith.constant 0 : i32
    %c0_i32_1 = arith.constant 0 : i32
    return %c0_i32, %c0_i32_0 : i32, i32
  }
  func.func @transform_5(%arg0: i32) -> (i32, i32) {
    %c0_i32 = arith.constant 0 : i32
    %c0_i32_0 = arith.constant 0 : i32
    return %arg0, %c0_i32 : i32, i32
  }
}

</mosaic_0001>

<bundles_post_ra>
// kernel: tpu_custom_call.1
= control target key start
LH: loop header
LB: loop body
LE: loop exit
PB: predicated region body
PF: predicated region fallthrough
CT: control target
= control target key end

     0   :  { %10 = vsyncpa [#allocation3], 0  ;;  %s4115_s0 = inlined_call_operand.hbm [shape: f32[2,32], index: 0, kind: input, shape index: {}]   ;;  %s4116_s1 = inlined_call_operand.hbm [shape: f32[32,64], index: 1, kind: input, shape index: {}]   ;;  %s4117_s2 = inlined_call_operand.vmem [shape: f32[1,32], index: 2, kind: input, shape index: {}]   ;;  %s4118_s3 = inlined_call_operand.hbm [shape: f32[32,64], index: 3, kind: input, shape index: {}]   ;;  %s4119_s4 = inlined_call_operand.vmem [shape: f32[1,64], index: 4, kind: input, shape index: {}]   ;;  %s4120_s5 = inlined_call_operand.hbm [shape: f32[2,256], index: 5, kind: output, shape index: {}]  }
   0x1   :  { %11 = vsyncpa [#allocation6], 0  ;;  %s28_s20 = sshll.u32 %s4116_s1, 4  ;;  %s29_s20 = int_to_ptr.hbm [resolvable:$true] %s28_s20 }
   0x2   :  { %12 = vsyncpa [#allocation4], 0  ;;  %s3318_s21 = smov [#allocation5]   ;;  %s18_s25 = sshll.u32 %s4115_s0, 4  ;;  %s19_s25 = int_to_ptr.hbm [resolvable:$true] %s18_s25 }
   0x3   :  { %s30_s22 = sshll.u32 %s3318_s21, 4  ;;  %s3319_s26 = smov 128   ;;  %s31_s22 = int_to_ptr.vmem [resolvable:$true] %s30_s22 }
   0x4   :  { %s3320_s27 = smov 8   ;;  %s3321_s28 = smov [#allocation2]  }
   0x5   :  { %36 = dma.hbm_to_vmem [thread:$0]  %s29_s20, 512, %s31_s22, [#allocation6], %s3319_s26, %s3319_s26, %s3320_s27  }
   0x6   :  { %s20_s29 = sshll.u32 %s3321_s28, 4  ;;  %s43_s7 = sshll.u32 %s4118_s3, 4  ;;  %s21_s29 = int_to_ptr.vmem [resolvable:$true] %s20_s29  ;;  %s44_s7 = int_to_ptr.hbm [resolvable:$true] %s43_s7 }
   0x7   :  { %23 = dma.hbm_to_vmem [thread:$0]  %s19_s25, 32, %s21_s29, [#allocation3]  }
   0x8   :  { %s3322_s1 = smov [#allocation7]  }
   0x9   :  { %s45_s8 = sshll.u32 %s3322_s1, 4  ;;  %s46_s8 = int_to_ptr.vmem [resolvable:$true] %s45_s8 }
   0xa   :  { %51 = dma.hbm_to_vmem [thread:$0]  %s44_s7, 512, %s46_s8, [#allocation6], %s3319_s26, %s3319_s26, %s3320_s27  }
   0xb   :  { %3312 = dma.done.wait [#allocation3], 32  }
   0xc   :  { %3313 = vsyncadd [#allocation3], 4294967264 }
   0xd   :  { %3314 = dma.done.wait [#allocation6], 1024  }
   0xe   :  { %3315 = vsyncadd [#allocation6], 4294966272  ;;  %v3373_v0 = vld [vmem:[#allocation5 + $0x18] sm:$0xff]  ;;  %v3375_v1 = vld [vmem:[#allocation5 + $0x10] sm:$0xff]  ;;  %vm83_vm0 = vcmask 261120   ;;  %s3323_s11 = smov 32  }
   0xf   :  { %99 = vmatpush.msra.mxu0 %v3373_v0  ;;  %475 = vmatpush.msra.mxu2 %v3373_v0  ;;  %v3379_v2 = vld [vmem:[#allocation5 + $0x8] sm:$0xff]  ;;  %v3383_v3 = vld [vmem:[#allocation5] sm:$0xff]  ;;  %v3386_v4 = vld [vmem:[#allocation2] sm:$0x3]  ;;  %v3324_v29 = vmov 683565275  }
  0x10   :  { %v3405_v5 = vld [vmem:[#allocation7 + $0x18] sm:$0xff]  ;;  %v3408_v6 = vld [vmem:[#allocation7 + $0x10] sm:$0xff]  ;;  %v3411_v7 = vld [vmem:[#allocation7 + $0x8] sm:$0xff]  ;;  %v3325_v31 = vmov 2475754826   ;;  %s3331_s12 = smov 96  }
  0x11   :  { %100 = vmatpush.msra.mxu0 %v3375_v1  ;;  %476 = vmatpush.msra.mxu2 %v3375_v1  ;;  %v3415_v8 = vld [vmem:[#allocation7] sm:$0xff]  ;;  %v3432_v9 = vld [vmem:[%s4117_s2] ss:$0 sm:$0xff]  ;;  %v3326_v34 = vmov 2131351028   ;;  %s3079_s24 = sshll.u32 %s4120_s5, 4  ;;  %s3080_s24 = int_to_ptr.hbm [resolvable:$true] %s3079_s24 }
  0x12   :  { %124 = vmatpush.msra.mxu1 %v3405_v5  ;;  %500 = vmatpush.msra.mxu3 %v3405_v5  ;;  %v3446_v13 = vld [vmem:[%s4119_s4] ss:$0 sm:$0xff]  ;;  %v3327_v37 = vmov 2102212464   ;;  %v3328_v40 = vmov 920167782  }
  0x13   :  { %101 = vmatpush.msra.mxu0 %v3379_v2  ;;  %477 = vmatpush.msra.mxu2 %v3379_v2  ;;  %v3329_v43 = vmov 1326507024  }
  0x14   :  { %125 = vmatpush.msra.mxu1 %v3408_v6  ;;  %501 = vmatpush.msra.mxu3 %v3408_v6 }
  0x15   :  { %102 = vmatpush.msra.mxu0 %v3383_v3  ;;  %478 = vmatpush.msra.mxu2 %v3383_v3 }
  0x16   :  { %3090 = vmatmul.msk.f32.vlgmr.msra.gmra.mxu0 %vm83_vm0, %v3386_v4  ;;  %126 = vmatpush.msra.mxu1 %v3411_v7 }
  0x17   :  { %1222 = vmatpush.msrb.mxu2 %v3373_v0  ;;  %847 = vmatpush.msrb.mxu0 %v3373_v0 }
  0x18   :  { %502 = vmatpush.msra.mxu3 %v3411_v7  ;;  %127 = vmatpush.msra.mxu1 %v3415_v8 }
  0x19   :  { %1223 = vmatpush.msrb.mxu2 %v3375_v1  ;;  %848 = vmatpush.msrb.mxu0 %v3375_v1 }
  0x1a   :  { %503 = vmatpush.msra.mxu3 %v3415_v8  ;;  %872 = vmatpush.msrb.mxu1 %v3405_v5 }
  0x1b   :  { %1224 = vmatpush.msrb.mxu2 %v3379_v2  ;;  %849 = vmatpush.msrb.mxu0 %v3379_v2 }
  0x1c   :  { %1247 = vmatpush.msrb.mxu3 %v3405_v5  ;;  %873 = vmatpush.msrb.mxu1 %v3408_v6 }
  0x1d   :  { %1225 = vmatpush.msrb.mxu2 %v3383_v3  ;;  %850 = vmatpush.msrb.mxu0 %v3383_v3 }
  0x1e   :  { %1248 = vmatpush.msrb.mxu3 %v3408_v6  ;;  %874 = vmatpush.msrb.mxu1 %v3411_v7 }
  0x1f   :  { %1597 = vmatpush.msra.mxu0 %v3373_v0 }
  0x20   :  { %1249 = vmatpush.msrb.mxu3 %v3411_v7  ;;  %875 = vmatpush.msrb.mxu1 %v3415_v8 }
  0x21   :  { %1598 = vmatpush.msra.mxu0 %v3375_v1 }
  0x22   :  { %1250 = vmatpush.msrb.mxu3 %v3415_v8 }
  0x23   :  { %1599 = vmatpush.msra.mxu0 %v3379_v2 }
  0x25   :  { %1600 = vmatpush.msra.mxu0 %v3383_v3 }
  0x93   :  { %v3434_v10 = vpop.f32.mrf.mxu0 }
  0x94   :  { %v107_v11 = vadd.f32 %v3432_v9, %v3434_v10 }
  0x96   :  { %3172 = vtanh.f32 %v107_v11 }
  0x9c   :  { %v3173_v12 = vpop.eup %3172 }
  0x9d   :  { %3091 = vmatmul.msk.f32.vlgmr.msra.gmra.mxu1 %vm83_vm0, %v3173_v12 }
  0x9e   :  { %1622 = vmatpush.msra.mxu1 %v3405_v5 }
  0xa0   :  { %1623 = vmatpush.msra.mxu1 %v3408_v6 }
  0xa2   :  { %1624 = vmatpush.msra.mxu1 %v3411_v7 }
  0xa4   :  { %1625 = vmatpush.msra.mxu1 %v3415_v8 }
 0x11a   :  { %v129_v14 = vpop.f32.mrf.mxu1 }
 0x11b   :  { %v3449_v15 = vadd.f32 %v3446_v13, %v129_v14 }
 0x11d   :  { %v137_v16 = vand.u32 2139095040, %v3449_v15  ;;  %v132_v17 = vmul.f32 1.442695, %v3449_v15  ;;  %v134_v20 = vand.u32 2147483647, %v3449_v15  ;;  %vm136_vm13 = vcmp.lt.s32.totalorder %v3449_v15, 0 }
 0x11f   :  { %v138_v18 = vshrl.u32 %v137_v16, 23  ;;  %3174 = vpow2.f32 %v132_v17  ;;  %v141_v24 = vand.u32 8388607, %v134_v20  ;;  %vm135_vm14 = vcmp.le.f32.partialorder %v134_v20, 0.7853982 }
 0x121   :  { %v3092_v19 = vadd.s32 4294967169, %v138_v18  ;;  %v142_v28 = vor.u32 8388608, %v141_v24 }
 0x123   :  { %v144_v21 = vadd.s32 1, %v3092_v19  ;;  %v3479_v50 = vshll.u32 %v142_v28, 8  ;;  %v3330_v28 = vmov 0  }
 0x125   :  { %v3175_v22 = vpop.eup %3174  ;;  %vm145_vm1 = vcmp.gt.s32.totalorder %v144_v21, 0  ;;  %v183_v59 = vand.u32 65535, %v3479_v50  ;;  %v184_v60 = vshrl.u32 %v3479_v50, 16 }
 0x126   :  { %v146_v23 = vsel %vm145_vm1, %v144_v21, 0  ;;  %289 = vrot.lane.b32.xlu0 %v3175_v22, %s3323_s11 }
 0x127   :  { %v148_v25 = vand.u32 31, %v146_v23  ;;  %v3459_v27 = vshrl.u32 %v146_v23, 5 }
 0x129   :  { %v3457_v26 = vsub.s32 32, %v148_v25  ;;  %v151_v30 = vshll.u32 %v3324_v29, %v148_v25  ;;  %v154_v32 = vshll.u32 %v3325_v31, %v148_v25  ;;  %v157_v36 = vshll.u32 %v3326_v34, %v148_v25 }
 0x12a   :  { %v160_v39 = vshll.u32 %v3327_v37, %v148_v25  ;;  %v163_v42 = vshll.u32 %v3328_v40, %v148_v25  ;;  %vm166_vm2 = vcmp.lt.s32.totalorder %v3459_v27, 1  ;;  %vm169_vm3 = vcmp.lt.s32.totalorder %v3459_v27, 4 }
 0x12b   :  { %v152_v33 = vshrl.u32 %v3325_v31, %v3457_v26  ;;  %v155_v35 = vshrl.u32 %v3326_v34, %v3457_v26  ;;  %v158_v38 = vshrl.u32 %v3327_v37, %v3457_v26  ;;  %v161_v41 = vshrl.u32 %v3328_v40, %v3457_v26 }
 0x12c   :  { %v164_v44 = vshrl.u32 %v3329_v43, %v3457_v26  ;;  %vm168_vm4 = vcmp.lt.s32.totalorder %v3459_v27, 3  ;;  %vm167_vm5 = vcmp.lt.s32.totalorder %v3459_v27, 2 }
 0x12d   :  { %v153_v45 = vor.u32 %v152_v33, %v151_v30  ;;  %v156_v46 = vor.u32 %v155_v35, %v154_v32  ;;  %v159_v47 = vor.u32 %v158_v38, %v157_v36  ;;  %v162_v48 = vor.u32 %v161_v41, %v160_v39 }
 0x12e   :  { %449 = vrot.lane.b32.xlu0 %v3386_v4, %s3323_s11  ;;  %v165_v49 = vor.u32 %v164_v44, %v163_v42  ;;  %v150_v42 = vshrl.u32 %v3324_v29, %v3457_v26 }
 0x12f   :  { %v174_v51 = vsel %vm166_vm2, %v153_v45, %v156_v46  ;;  %v178_v52 = vsel %vm166_vm2, %v156_v46, %v159_v47  ;;  %v175_v53 = vsel %vm169_vm3, %v162_v48, 920167782  ;;  %v171_v38 = vsel %vm169_vm3, %v159_v47, 2102212464 }
 0x130   :  { %v179_v54 = vsel %vm169_vm3, %v165_v49, 1326507024  ;;  %v176_v55 = vsel %vm168_vm4, %v159_v47, %v175_v53  ;;  %v170_v53 = vsel %vm166_vm2, %v150_v42, %v153_v45 }
 0x131   :  { %v180_v56 = vsel %vm168_vm4, %v162_v48, %v179_v54  ;;  %v177_v57 = vsel %vm167_vm5, %v174_v51, %v176_v55  ;;  %v172_v54 = vsel %vm168_vm4, %v156_v46, %v171_v38 }
 0x132   :  { %v181_v58 = vsel %vm167_vm5, %v178_v52, %v180_v56  ;;  %v207_v63 = vand.u32 65535, %v177_v57  ;;  %v208_v4 = vshrl.u32 %v177_v57, 16  ;;  %v173_v26 = vsel %vm167_vm5, %v170_v53, %v172_v54 }
 0x133   :  { %v185_v61 = vand.u32 65535, %v181_v58  ;;  %v186_v62 = vshrl.u32 %v181_v58, 16 }
 0x134   :  { %v210_v14 = vmul.u32 %v208_v4, %v183_v59  ;;  %v211_v16 = vmul.u32 %v207_v63, %v184_v60  ;;  %v209_v21 = vmul.u32 %v207_v63, %v183_v59  ;;  %v212_v25 = vmul.u32 %v208_v4, %v184_v60 }
 0x135   :  { %v188_v11 = vmul.u32 %v186_v62, %v183_v59  ;;  %v189_v12 = vmul.u32 %v185_v61, %v184_v60  ;;  %v187_v17 = vmul.u32 %v185_v61, %v183_v59  ;;  %v190_v19 = vmul.u32 %v186_v62, %v184_v60 }
 0x136   :  { %v213_v22 = vshll.u32 %v210_v14, 16  ;;  %v215_v32 = vshll.u32 %v211_v16, 16  ;;  %v214_v51 = vshrl.u32 %v210_v14, 16  ;;  %v216_v56 = vshrl.u32 %v211_v16, 16 }
 0x137   :  { %v191_v18 = vshll.u32 %v188_v11, 16  ;;  %v193_v23 = vshll.u32 %v189_v12, 16  ;;  %v192_v44 = vshrl.u32 %v188_v11, 16  ;;  %v194_v47 = vshrl.u32 %v189_v12, 16 }
 0x138   :  { %vm217_vm7 = vc.u32 %v209_v21, %v213_v22  ;;  %v219_v33 = vadd.s32 %v213_v22, %v209_v21  ;;  %v227_v62 = vmul.u32 %v3479_v50, %v173_v26 }
 0x139   :  { %vm195_vm6 = vc.u32 %v187_v17, %v191_v18  ;;  %v197_v24 = vadd.s32 %v191_v18, %v187_v17  ;;  %v218_v36 = vsel %vm217_vm7, 1, %v3330_v28  ;;  %vm459_vm7 = vcmask 254976  }
 0x13a   :  { %v196_v30 = vsel %vm195_vm6, 1, %v3330_v28  ;;  %v220_v41 = vadd.s32 %v218_v36, %v212_v25  ;;  %vm221_vm9 = vc.u32 %v219_v33, %v215_v32  ;;  %v223_v59 = vadd.s32 %v219_v33, %v215_v32 }
 0x13b   :  { %v198_v35 = vadd.s32 %v196_v30, %v190_v19  ;;  %vm199_vm8 = vc.u32 %v197_v24, %v193_v23  ;;  %v222_v49 = vsel %vm221_vm9, 1, %v3330_v28  ;;  %vm277_vm6 = vweird.f32 %v3449_v15 }
 0x13c   :  { %v200_v39 = vsel %vm199_vm8, 1, %v3330_v28  ;;  %v224_v52 = vadd.s32 %v222_v49, %v220_v41 }
 0x13d   :  { %v202_v48 = vadd.s32 %v200_v39, %v198_v35 }
 0x13e   :  { %v225_v57 = vadd.s32 %v224_v52, %v214_v51 }
 0x13f   :  { %v203_v55 = vadd.s32 %v202_v48, %v192_v44 }
 0x140   :  { %v226_v60 = vadd.s32 %v225_v57, %v216_v56 }
 0x141   :  { %v204_v58 = vadd.s32 %v203_v55, %v194_v47 }
 0x142   :  { %v230_v61 = vadd.s32 1, %v226_v60 }
 0x143   :  { %vm229_vm10 = vc.u32 %v204_v58, %v223_v59  ;;  %v228_v27 = vadd.s32 %v223_v59, %v204_v58 }
 0x144   :  { %v231_v63 = vsel %vm229_vm10, %v230_v61, %v226_v60 }
 0x145   :  { %v232_v4 = vadd.s32 %v231_v63, %v227_v62 }
 0x147   :  { %v233_v45 = vadd.s32 536870912, %v232_v4 }
 0x149   :  { %v234_v11 = vshrl.u32 %v233_v45, 30 }
 0x14b   :  { %v235_v14 = vshll.u32 %v234_v11, 30  ;;  %v258_v54 = vsub.s32 4, %v234_v11 }
 0x14d   :  { %v236_v46 = vsub.s32 %v232_v4, %v235_v14  ;;  %v259_v56 = vsel %vm136_vm13, %v258_v54, %v234_v11 }
 0x14e   :  { %v261_v58 = vsel %vm135_vm14, 0, %v259_v56 }
 0x14f   :  { %vm237_vm11 = vcmp.lt.s32.totalorder %v236_v46, 0  ;;  %v238_v12 = vsub.s32 0, %v236_v46  ;;  %v437_v60 = vadd.s32 3, %v261_v58  ;;  %v278_v4 = vand.u32 3, %v261_v58 }
 0x151   :  { %v239_v16 = vsel %vm237_vm11, %v238_v12, %v236_v46  ;;  %v438_v62 = vand.u32 3, %v437_v60  ;;  %vm280_vm1 = vcmp.eq.s32.totalorder %v278_v4, 0  ;;  %vm283_vm4 = vcmp.eq.s32.totalorder %v278_v4, 2 }
 0x152   :  { %v240_v17 = vclz %v239_v16  ;;  %vm279_vm5 = vcmp.lt.s32.totalorder %v278_v4, 2 }
 0x153   :  { %vm440_vm15 = vcmp.eq.s32.totalorder %v438_v62, 0  ;;  %vm443_vm2 = vcmp.eq.s32.totalorder %v438_v62, 2  ;;  %vm439_vm3 = vcmp.lt.s32.totalorder %v438_v62, 2 }
 0x154   :  { %v3093_v18 = vadd.s32 4294967294, %v240_v17 }
 0x156   :  { %vm3094_vm12 = vcmp.lt.s32.totalorder %v3093_v18, 0 }
 0x157   :  { %v243_v19 = vsel %vm3094_vm12, 0, %v3093_v18 }
 0x158   :  { %v244_v21 = vsub.s32 32, %v243_v19  ;;  %v248_v22 = vsub.s32 4294967266, %v243_v19  ;;  %v245_v23 = vshll.u32 %v236_v46, %v243_v19 }
 0x15a   :  { %v246_v24 = vshrl.u32 %v228_v27, %v244_v21  ;;  %v249_v25 = vadd.s32 127, %v248_v22 }
 0x15c   :  { %v247_v50 = vor.u32 %v246_v24, %v245_v23  ;;  %v250_v30 = vshll.u32 %v249_v25, 23 }
 0x15e   :  { %v251_v32 = vor.u32 4788187, %v250_v30  ;;  %v254_v35 = vcvt.s32.f32 %v247_v50 }
 0x160   :  { %v252_v33 = vand.u32 2147483647, %v251_v32 }
 0x162   :  { %v255_v36 = vmul.f32 %v254_v35, %v252_v33 }
 0x164   :  { %v256_v38 = vxor.u32 2147483648, %v255_v36 }
 0x166   :  { %v257_v39 = vsel %vm136_vm13, %v256_v38, %v255_v36 }
 0x167   :  { %v260_v41 = vsel %vm135_vm14, %v3449_v15, %v257_v39 }
 0x168   :  { %v262_v42 = vmul.f32 %v260_v41, %v260_v41 }
 0x16a   :  { %v270_v44 = vmul.f32 -0.00019511016, %v262_v42  ;;  %v263_v49 = vmul.f32 -0.001358992, %v262_v42 }
 0x16c   :  { %v271_v48 = vadd.f32 0.008332121, %v270_v44  ;;  %v264_v52 = vadd.f32 0.041655596, %v263_v49 }
 0x16e   :  { %v272_v51 = vmul.f32 %v271_v48, %v262_v42  ;;  %v265_v47 = vmul.f32 %v264_v52, %v262_v42 }
 0x170   :  { %v273_v53 = vadd.f32 -0.16666654, %v272_v51  ;;  %v266_v57 = vadd.f32 -0.4999988, %v265_v47 }
 0x172   :  { %v274_v55 = vmul.f32 %v273_v53, %v262_v42  ;;  %v267_v26 = vmul.f32 %v266_v57, %v262_v42 }
 0x174   :  { %v275_v59 = vadd.f32 1.0, %v274_v55  ;;  %v268_v20 = vadd.f32 1.0, %v267_v26 }
 0x176   :  { %v276_v61 = vmul.f32 %v275_v59, %v260_v41  ;;  %v284_v45 = vxor.u32 2147483648, %v268_v20 }
 0x178   :  { %v281_v63 = vxor.u32 2147483648, %v276_v61  ;;  %v445_v12 = vsel %vm443_vm2, %v284_v45, %v276_v61  ;;  %v285_v17 = vsel %vm283_vm4, %v284_v45, %v276_v61 }
 0x17a   :  { %v442_v14 = vsel %vm440_vm15, %v268_v20, %v281_v63  ;;  %v282_v46 = vsel %vm280_vm1, %v268_v20, %v281_v63 }
 0x17b   :  { %v446_v11 = vsel %vm439_vm3, %v442_v14, %v445_v12  ;;  %v286_v18 = vsel %vm279_vm5, %v282_v46, %v285_v17 }
 0x17c   :  { %v447_v19 = vsel %vm277_vm6, nan, %v446_v11  ;;  %v287_v21 = vsel %vm277_vm6, nan, %v286_v18 }
 0x198   :  { %v290_v16 = vpop.permute.xlu0 %289 }
 0x199   :  { %v448_v27 = vmul.f32 %v447_v19, %v290_v16  ;;  %v292_v22 = vmul.f32 %v290_v16, %v287_v21 }
 0x19b   :  { %v453_v25 = vmul.f32 %v448_v27, %v3434_v10 }
 0x1a0   :  { %v450_v23 = vpop.permute.xlu0 %449 }
 0x1a1   :  { %v452_v24 = vmul.f32 %v450_v23, %v292_v22 }
 0x1a3   :  { %v3523_v50 = vadd.f32 %v453_v25, %v452_v24 }
 0x1a5   :  { %456 = vrot.lane.b32.xlu1 %v3523_v50, %s3331_s12 }
 0x217   :  { %v457_v30 = vpop.permute.xlu1 %456 }
 0x218   :  { %460 = vst.msk [vmem:[#allocation8] sm:$0x3] %vm459_vm7, %v457_v30  ;;  %3098 = vmatmul.msk.f32.vlgmr.msra.gmra.mxu2 %vm83_vm0, %v457_v30 }
 0x219   :  { %1969 = vmatpush.msra.mxu2 %v3373_v0 }
 0x21b   :  { %1970 = vmatpush.msra.mxu2 %v3375_v1 }
 0x21d   :  { %1971 = vmatpush.msra.mxu2 %v3379_v2 }
 0x21f   :  { %1972 = vmatpush.msra.mxu2 %v3383_v3 }
 0x29b   :  { %v3533_v10 = vpop.f32.mrf.mxu2 }
 0x29c   :  { %v483_v15 = vadd.f32 %v3432_v9, %v3533_v10 }
 0x29e   :  { %3176 = vtanh.f32 %v483_v15 }
 0x2a4   :  { %v3177_v32 = vpop.eup %3176 }
 0x2a5   :  { %3099 = vmatmul.msk.f32.vlgmr.msra.gmra.mxu3 %vm83_vm0, %v3177_v32 }
 0x2a6   :  { %1994 = vmatpush.msra.mxu3 %v3405_v5 }
 0x2a8   :  { %1995 = vmatpush.msra.mxu3 %v3408_v6 }
 0x2aa   :  { %1996 = vmatpush.msra.mxu3 %v3411_v7 }
 0x2ac   :  { %1997 = vmatpush.msra.mxu3 %v3415_v8 }
 0x328   :  { %v505_v33 = vpop.f32.mrf.mxu3 }
 0x329   :  { %v3543_v35 = vadd.f32 %v3446_v13, %v505_v33 }
 0x32b   :  { %v513_v36 = vand.u32 2139095040, %v3543_v35  ;;  %v508_v38 = vmul.f32 1.442695, %v3543_v35  ;;  %v510_v42 = vand.u32 2147483647, %v3543_v35  ;;  %vm512_vm5 = vcmp.lt.s32.totalorder %v3543_v35, 0 }
 0x32d   :  { %v514_v39 = vshrl.u32 %v513_v36, 23  ;;  %3178 = vpow2.f32 %v508_v38  ;;  %v517_v51 = vand.u32 8388607, %v510_v42  ;;  %vm511_vm6 = vcmp.le.f32.partialorder %v510_v42, 0.7853982 }
 0x32f   :  { %v3100_v41 = vadd.s32 4294967169, %v514_v39  ;;  %v518_v47 = vor.u32 8388608, %v517_v51 }
 0x331   :  { %v520_v44 = vadd.s32 1, %v3100_v41  ;;  %v3564_v12 = vshll.u32 %v518_v47, 8 }
 0x333   :  { %v3179_v48 = vpop.eup %3178  ;;  %vm521_vm8 = vcmp.gt.s32.totalorder %v520_v44, 0  ;;  %v559_v23 = vand.u32 65535, %v3564_v12  ;;  %v560_v24 = vshrl.u32 %v3564_v12, 16 }
 0x334   :  { %v522_v49 = vsel %vm521_vm8, %v520_v44, 0  ;;  %665 = vrot.lane.b32.xlu1 %v3179_v48, %s3323_s11 }
 0x335   :  { %v524_v52 = vand.u32 31, %v522_v49  ;;  %v3551_v54 = vshrl.u32 %v522_v49, 5 }
 0x337   :  { %v525_v53 = vsub.s32 32, %v524_v52  ;;  %v527_v55 = vshll.u32 %v3324_v29, %v524_v52  ;;  %v530_v56 = vshll.u32 %v3325_v31, %v524_v52  ;;  %v533_v59 = vshll.u32 %v3326_v34, %v524_v52 }
 0x338   :  { %v536_v60 = vshll.u32 %v3327_v37, %v524_v52  ;;  %v539_v20 = vshll.u32 %v3328_v40, %v524_v52  ;;  %vm542_vm9 = vcmp.lt.s32.totalorder %v3551_v54, 1  ;;  %vm545_vm10 = vcmp.lt.s32.totalorder %v3551_v54, 4 }
 0x339   :  { %v528_v57 = vshrl.u32 %v3325_v31, %v525_v53  ;;  %v531_v58 = vshrl.u32 %v3326_v34, %v525_v53  ;;  %v534_v26 = vshrl.u32 %v3327_v37, %v525_v53  ;;  %v537_v61 = vshrl.u32 %v3328_v40, %v525_v53 }
 0x33a   :  { %v540_v62 = vshrl.u32 %v3329_v43, %v525_v53  ;;  %vm544_vm11 = vcmp.lt.s32.totalorder %v3551_v54, 3  ;;  %vm543_vm12 = vcmp.lt.s32.totalorder %v3551_v54, 2 }
 0x33b   :  { %v529_v63 = vor.u32 %v528_v57, %v527_v55  ;;  %v532_v4 = vor.u32 %v531_v58, %v530_v56  ;;  %v535_v45 = vor.u32 %v534_v26, %v533_v59  ;;  %v538_v14 = vor.u32 %v537_v61, %v536_v60 }
 0x33c   :  { %v541_v46 = vor.u32 %v540_v62, %v539_v20  ;;  %v526_v62 = vshrl.u32 %v3324_v29, %v525_v53 }
 0x33d   :  { %v550_v16 = vsel %vm542_vm9, %v529_v63, %v532_v4  ;;  %v554_v11 = vsel %vm542_vm9, %v532_v4, %v535_v45  ;;  %v551_v17 = vsel %vm545_vm10, %v538_v14, 920167782  ;;  %v547_v60 = vsel %vm545_vm10, %v535_v45, 2102212464 }
 0x33e   :  { %v555_v18 = vsel %vm545_vm10, %v541_v46, 1326507024  ;;  %v552_v19 = vsel %vm544_vm11, %v535_v45, %v551_v17 }
 0x33f   :  { %v556_v27 = vsel %vm544_vm11, %v538_v14, %v555_v18  ;;  %v553_v21 = vsel %vm543_vm12, %v550_v16, %v552_v19  ;;  %v546_v18 = vsel %vm542_vm9, %v526_v62, %v529_v63  ;;  %v548_v19 = vsel %vm544_vm11, %v532_v4, %v547_v60 }
 0x340   :  { %v557_v22 = vsel %vm543_vm12, %v554_v11, %v556_v27  ;;  %v583_v15 = vand.u32 65535, %v553_v21  ;;  %v584_v32 = vshrl.u32 %v553_v21, 16  ;;  %v549_v53 = vsel %vm543_vm12, %v546_v18, %v548_v19 }
 0x341   :  { %v561_v25 = vand.u32 65535, %v557_v22  ;;  %v562_v30 = vshrl.u32 %v557_v22, 16 }
 0x342   :  { %v586_v38 = vmul.u32 %v584_v32, %v559_v23  ;;  %v587_v39 = vmul.u32 %v583_v15, %v560_v24  ;;  %v585_v49 = vmul.u32 %v583_v15, %v559_v23  ;;  %v588_v55 = vmul.u32 %v584_v32, %v560_v24 }
 0x343   :  { %v564_v33 = vmul.u32 %v562_v30, %v559_v23  ;;  %v565_v36 = vmul.u32 %v561_v25, %v560_v24  ;;  %v563_v41 = vmul.u32 %v561_v25, %v559_v23  ;;  %v566_v48 = vmul.u32 %v562_v30, %v560_v24 }
 0x344   :  { %v589_v51 = vshll.u32 %v586_v38, 16  ;;  %v591_v57 = vshll.u32 %v587_v39, 16  ;;  %v590_v11 = vshrl.u32 %v586_v38, 16  ;;  %v592_v21 = vshrl.u32 %v587_v39, 16 }
 0x345   :  { %v567_v44 = vshll.u32 %v564_v33, 16  ;;  %v569_v52 = vshll.u32 %v565_v36, 16  ;;  %v568_v14 = vshrl.u32 %v564_v33, 16  ;;  %v570_v27 = vshrl.u32 %v565_v36, 16 }
 0x346   :  { %vm593_vm14 = vc.u32 %v585_v49, %v589_v51  ;;  %v595_v58 = vadd.s32 %v589_v51, %v585_v49  ;;  %v603_v15 = vmul.u32 %v3564_v12, %v549_v53 }
 0x347   :  { %vm571_vm13 = vc.u32 %v563_v41, %v567_v44  ;;  %v573_v47 = vadd.s32 %v567_v44, %v563_v41  ;;  %v594_v26 = vsel %vm593_vm14, 1, %v3330_v28  ;;  %vm653_vm14 = vweird.f32 %v3543_v35 }
 0x348   :  { %v572_v56 = vsel %vm571_vm13, 1, %v3330_v28  ;;  %v596_v20 = vadd.s32 %v594_v26, %v588_v55  ;;  %vm597_vm1 = vc.u32 %v595_v58, %v591_v57  ;;  %v599_v24 = vadd.s32 %v595_v58, %v591_v57 }
 0x349   :  { %v574_v59 = vadd.s32 %v572_v56, %v566_v48  ;;  %vm575_vm15 = vc.u32 %v573_v47, %v569_v52  ;;  %v598_v16 = vsel %vm597_vm1, 1, %v3330_v28 }
 0x34a   :  { %v576_v61 = vsel %vm575_vm15, 1, %v3330_v28  ;;  %v600_v17 = vadd.s32 %v598_v16, %v596_v20  ;;  %vm828_vm15 = vcmask 517376  }
 0x34b   :  { %v578_v46 = vadd.s32 %v576_v61, %v574_v59 }
 0x34c   :  { %v601_v22 = vadd.s32 %v600_v17, %v590_v11 }
 0x34d   :  { %v579_v45 = vadd.s32 %v578_v46, %v568_v14 }
 0x34e   :  { %v602_v25 = vadd.s32 %v601_v22, %v592_v21 }
 0x34f   :  { %v580_v23 = vadd.s32 %v579_v45, %v570_v27 }
 0x350   :  { %v606_v30 = vadd.s32 1, %v602_v25 }
 0x351   :  { %vm605_vm2 = vc.u32 %v580_v23, %v599_v24  ;;  %v604_v54 = vadd.s32 %v599_v24, %v580_v23 }
 0x352   :  { %v607_v32 = vsel %vm605_vm2, %v606_v30, %v602_v25 }
 0x353   :  { %v608_v33 = vadd.s32 %v607_v32, %v603_v15 }
 0x355   :  { %v609_v63 = vadd.s32 536870912, %v608_v33 }
 0x357   :  { %v610_v38 = vshrl.u32 %v609_v63, 30 }
 0x359   :  { %v611_v41 = vshll.u32 %v610_v38, 30  ;;  %v634_v27 = vsub.s32 4, %v610_v38 }
 0x35b   :  { %v612_v4 = vsub.s32 %v608_v33, %v611_v41  ;;  %v635_v22 = vsel %vm512_vm5, %v634_v27, %v610_v38 }
 0x35c   :  { %v637_v24 = vsel %vm511_vm6, 0, %v635_v22 }
 0x35d   :  { %vm613_vm3 = vcmp.lt.s32.totalorder %v612_v4, 0  ;;  %v614_v36 = vsub.s32 0, %v612_v4  ;;  %v813_v30 = vadd.s32 3, %v637_v24  ;;  %v654_v32 = vand.u32 3, %v637_v24 }
 0x35f   :  { %v615_v39 = vsel %vm613_vm3, %v614_v36, %v612_v4  ;;  %v814_v33 = vand.u32 3, %v813_v30  ;;  %vm656_vm8 = vcmp.eq.s32.totalorder %v654_v32, 0  ;;  %vm659_vm10 = vcmp.eq.s32.totalorder %v654_v32, 2 }
 0x360   :  { %v616_v44 = vclz %v615_v39  ;;  %vm655_vm12 = vcmp.lt.s32.totalorder %v654_v32, 2 }
 0x361   :  { %vm816_vm9 = vcmp.eq.s32.totalorder %v814_v33, 0  ;;  %vm819_vm11 = vcmp.eq.s32.totalorder %v814_v33, 2  ;;  %vm815_vm13 = vcmp.lt.s32.totalorder %v814_v33, 2 }
 0x362   :  { %v3101_v48 = vadd.s32 4294967294, %v616_v44 }
 0x364   :  { %vm3102_vm4 = vcmp.lt.s32.totalorder %v3101_v48, 0 }
 0x365   :  { %v619_v49 = vsel %vm3102_vm4, 0, %v3101_v48 }
 0x366   :  { %v620_v51 = vsub.s32 32, %v619_v49  ;;  %v624_v52 = vsub.s32 4294967266, %v619_v49  ;;  %v621_v47 = vshll.u32 %v612_v4, %v619_v49 }
 0x368   :  { %v622_v55 = vshrl.u32 %v604_v54, %v620_v51  ;;  %v625_v56 = vadd.s32 127, %v624_v52 }
 0x36a   :  { %v623_v12 = vor.u32 %v622_v55, %v621_v47  ;;  %v626_v57 = vshll.u32 %v625_v56, 23 }
 0x36c   :  { %v627_v58 = vor.u32 4788187, %v626_v57  ;;  %v630_v26 = vcvt.s32.f32 %v623_v12 }
 0x36e   :  { %v628_v59 = vand.u32 2147483647, %v627_v58 }
 0x370   :  { %v631_v60 = vmul.f32 %v630_v26, %v628_v59 }
 0x372   :  { %v632_v61 = vxor.u32 2147483648, %v631_v60 }
 0x374   :  { %v633_v20 = vsel %vm512_vm5, %v632_v61, %v631_v60 }
 0x375   :  { %v636_v62 = vsel %vm511_vm6, %v3543_v35, %v633_v20 }
 0x376   :  { %v638_v14 = vmul.f32 %v636_v62, %v636_v62 }
 0x378   :  { %v646_v46 = vmul.f32 -0.00019511016, %v638_v14  ;;  %v639_v11 = vmul.f32 -0.001358992, %v638_v14 }
 0x37a   :  { %v647_v16 = vadd.f32 0.008332121, %v646_v46  ;;  %v640_v18 = vadd.f32 0.041655596, %v639_v11 }
 0x37c   :  { %v648_v17 = vmul.f32 %v647_v16, %v638_v14  ;;  %v641_v45 = vmul.f32 %v640_v18, %v638_v14 }
 0x37e   :  { %v649_v19 = vadd.f32 -0.16666654, %v648_v17  ;;  %v642_v23 = vadd.f32 -0.4999988, %v641_v45 }
 0x380   :  { %v650_v21 = vmul.f32 %v649_v19, %v638_v14  ;;  %v643_v25 = vmul.f32 %v642_v23, %v638_v14 }
 0x382   :  { %v651_v53 = vadd.f32 1.0, %v650_v21  ;;  %v644_v42 = vadd.f32 1.0, %v643_v25 }
 0x384   :  { %v652_v15 = vmul.f32 %v651_v53, %v636_v62  ;;  %v660_v41 = vxor.u32 2147483648, %v644_v42 }
 0x386   :  { %v657_v63 = vxor.u32 2147483648, %v652_v15  ;;  %v661_v39 = vsel %vm659_vm10, %v660_v41, %v652_v15  ;;  %v821_v38 = vsel %vm819_vm11, %v660_v41, %v652_v15 }
 0x388   :  { %v658_v4 = vsel %vm656_vm8, %v644_v42, %v657_v63  ;;  %v818_v36 = vsel %vm816_vm9, %v644_v42, %v657_v63 }
 0x389   :  { %v662_v44 = vsel %vm655_vm12, %v658_v4, %v661_v39  ;;  %v822_v48 = vsel %vm815_vm13, %v818_v36, %v821_v38 }
 0x38a   :  { %v663_v49 = vsel %vm653_vm14, nan, %v662_v44  ;;  %v823_v54 = vsel %vm653_vm14, nan, %v822_v48 }
 0x3a6   :  { %v666_v51 = vpop.permute.xlu1 %665 }
 0x3a7   :  { %v668_v52 = vmul.f32 %v666_v51, %v663_v49  ;;  %v824_v47 = vmul.f32 %v823_v54, %v666_v51 }
 0x3a9   :  { %v825_v55 = vmul.f32 %v668_v52, %v3523_v50  ;;  %v826_v56 = vmul.f32 %v824_v47, %v3533_v10 }
 0x3ab   :  { %v3608_v12 = vadd.f32 %v826_v56, %v825_v55 }
 0x3ad   :  { %831 = vrot.lane.b32.xlu2 %v3608_v12, %s3331_s12  ;;  %829 = vst.msk [vmem:[#allocation8] sm:$0x3] %vm828_vm15, %v3608_v12 }
 0x407   :  { %v832_v57 = vpop.permute.xlu2 %831 }
 0x408   :  { %3106 = vmatmul.msk.f32.vlgmr.msrb.gmra.mxu0 %vm83_vm0, %v832_v57 }
 0x409   :  { %2340 = vmatpush.msrb.mxu0 %v3373_v0 }
 0x40b   :  { %2341 = vmatpush.msrb.mxu0 %v3375_v1 }
 0x40d   :  { %2342 = vmatpush.msrb.mxu0 %v3379_v2 }
 0x40f   :  { %2343 = vmatpush.msrb.mxu0 %v3383_v3 }
 0x485   :  { %v3619_v50 = vpop.f32.mrf.mxu0 }
 0x486   :  { %v855_v10 = vadd.f32 %v3432_v9, %v3619_v50 }
 0x488   :  { %3180 = vtanh.f32 %v855_v10 }
 0x48e   :  { %v3181_v35 = vpop.eup %3180 }
 0x48f   :  { %3107 = vmatmul.msk.f32.vlgmr.msrb.gmra.mxu1 %vm83_vm0, %v3181_v35 }
 0x490   :  { %2365 = vmatpush.msrb.mxu1 %v3405_v5 }
 0x492   :  { %2366 = vmatpush.msrb.mxu1 %v3408_v6 }
 0x494   :  { %2367 = vmatpush.msrb.mxu1 %v3411_v7 }
 0x496   :  { %2368 = vmatpush.msrb.mxu1 %v3415_v8 }
 0x50c   :  { %v877_v0 = vpop.f32.mrf.mxu1 }
 0x50d   :  { %v3629_v1 = vadd.f32 %v3446_v13, %v877_v0 }
 0x50f   :  { %v885_v2 = vand.u32 2139095040, %v3629_v1  ;;  %v880_v3 = vmul.f32 1.442695, %v3629_v1  ;;  %v882_v59 = vand.u32 2147483647, %v3629_v1  ;;  %vm884_vm14 = vcmp.lt.s32.totalorder %v3629_v1, 0 }
 0x511   :  { %v886_v9 = vshrl.u32 %v885_v2, 23  ;;  %3182 = vpow2.f32 %v880_v3  ;;  %v889_v7 = vand.u32 8388607, %v882_v59 }
 0x513   :  { %v3108_v58 = vadd.s32 4294967169, %v886_v9  ;;  %v890_v61 = vor.u32 8388608, %v889_v7 }
 0x515   :  { %v892_v5 = vadd.s32 1, %v3108_v58  ;;  %v3650_v53 = vshll.u32 %v890_v61, 8 }
 0x517   :  { %v3183_v26 = vpop.eup %3182  ;;  %vm893_vm1 = vcmp.gt.s32.totalorder %v892_v5, 0  ;;  %v931_v4 = vand.u32 65535, %v3650_v53  ;;  %v932_v36 = vshrl.u32 %v3650_v53, 16 }
 0x518   :  { %v894_v6 = vsel %vm893_vm1, %v892_v5, 0  ;;  %1037 = vrot.lane.b32.xlu2 %v3183_v26, %s3323_s11  ;;  %vm883_vm1 = vcmp.le.f32.partialorder %v882_v59, 0.7853982 }
 0x519   :  { %v896_v8 = vand.u32 31, %v894_v6  ;;  %v3637_v60 = vshrl.u32 %v894_v6, 5 }
 0x51b   :  { %v897_v13 = vsub.s32 32, %v896_v8  ;;  %v899_v20 = vshll.u32 %v3324_v29, %v896_v8  ;;  %v902_v62 = vshll.u32 %v3325_v31, %v896_v8  ;;  %v905_v16 = vshll.u32 %v3326_v34, %v896_v8 }
 0x51c   :  { %v908_v17 = vshll.u32 %v3327_v37, %v896_v8  ;;  %v911_v19 = vshll.u32 %v3328_v40, %v896_v8  ;;  %vm914_vm2 = vcmp.lt.s32.totalorder %v3637_v60, 1  ;;  %vm917_vm3 = vcmp.lt.s32.totalorder %v3637_v60, 4 }
 0x51d   :  { %v900_v14 = vshrl.u32 %v3325_v31, %v897_v13  ;;  %v903_v46 = vshrl.u32 %v3326_v34, %v897_v13  ;;  %v906_v11 = vshrl.u32 %v3327_v37, %v897_v13  ;;  %v909_v18 = vshrl.u32 %v3328_v40, %v897_v13 }
 0x51e   :  { %v912_v27 = vshrl.u32 %v3329_v43, %v897_v13  ;;  %vm916_vm4 = vcmp.lt.s32.totalorder %v3637_v60, 3  ;;  %vm915_vm5 = vcmp.lt.s32.totalorder %v3637_v60, 2  ;;  %v898_v61 = vshrl.u32 %v3324_v29, %v897_v13 }
 0x51f   :  { %v901_v45 = vor.u32 %v900_v14, %v899_v20  ;;  %v904_v21 = vor.u32 %v903_v46, %v902_v62  ;;  %v907_v22 = vor.u32 %v906_v11, %v905_v16  ;;  %v910_v23 = vor.u32 %v909_v18, %v908_v17 }
 0x520   :  { %v913_v24 = vor.u32 %v912_v27, %v911_v19 }
 0x521   :  { %v922_v25 = vsel %vm914_vm2, %v901_v45, %v904_v21  ;;  %v926_v30 = vsel %vm914_vm2, %v904_v21, %v907_v22  ;;  %v923_v15 = vsel %vm917_vm3, %v910_v23, 920167782  ;;  %v919_v6 = vsel %vm917_vm3, %v907_v22, 2102212464 }
 0x522   :  { %v927_v42 = vsel %vm917_vm3, %v913_v24, 1326507024  ;;  %v924_v32 = vsel %vm916_vm4, %v907_v22, %v923_v15  ;;  %v918_v11 = vsel %vm914_vm2, %v898_v61, %v901_v45  ;;  %v920_v17 = vsel %vm916_vm4, %v904_v21, %v919_v6 }
 0x523   :  { %v928_v33 = vsel %vm916_vm4, %v910_v23, %v927_v42  ;;  %v925_v63 = vsel %vm915_vm5, %v922_v25, %v924_v32  ;;  %v921_v13 = vsel %vm915_vm5, %v918_v11, %v920_v17 }
 0x524   :  { %v929_v41 = vsel %vm915_vm5, %v926_v30, %v928_v33  ;;  %v955_v44 = vand.u32 65535, %v925_v63  ;;  %v956_v48 = vshrl.u32 %v925_v63, 16  ;;  %v975_v15 = vmul.u32 %v3650_v53, %v921_v13 }
 0x525   :  { %v933_v39 = vand.u32 65535, %v929_v41  ;;  %v934_v38 = vshrl.u32 %v929_v41, 16 }
 0x526   :  { %v958_v51 = vmul.u32 %v956_v48, %v931_v4  ;;  %v959_v52 = vmul.u32 %v955_v44, %v932_v36  ;;  %v957_v57 = vmul.u32 %v955_v44, %v931_v4  ;;  %v960_v2 = vmul.u32 %v956_v48, %v932_v36 }
 0x527   :  { %v936_v49 = vmul.u32 %v934_v38, %v931_v4  ;;  %v937_v54 = vmul.u32 %v933_v39, %v932_v36  ;;  %v935_v47 = vmul.u32 %v933_v39, %v931_v4  ;;  %v938_v56 = vmul.u32 %v934_v38, %v932_v36 }
 0x528   :  { %v961_v10 = vshll.u32 %v958_v51, 16  ;;  %v963_v9 = vshll.u32 %v959_v52, 16  ;;  %v962_v46 = vshrl.u32 %v958_v51, 16  ;;  %v964_v27 = vshrl.u32 %v959_v52, 16 }
 0x529   :  { %v939_v55 = vshll.u32 %v936_v49, 16  ;;  %v941_v35 = vshll.u32 %v937_v54, 16  ;;  %v940_v20 = vshrl.u32 %v936_v49, 16  ;;  %v942_v18 = vshrl.u32 %v937_v54, 16 }
 0x52a   :  { %vm965_vm8 = vc.u32 %v957_v57, %v961_v10  ;;  %v967_v58 = vadd.s32 %v961_v10, %v957_v57 }
 0x52b   :  { %vm943_vm6 = vc.u32 %v935_v47, %v939_v55  ;;  %v945_v0 = vadd.s32 %v939_v55, %v935_v47  ;;  %v966_v26 = vsel %vm965_vm8, 1, %v3330_v28 }
 0x52c   :  { %v944_v3 = vsel %vm943_vm6, 1, %v3330_v28  ;;  %v968_v8 = vadd.s32 %v966_v26, %v960_v2  ;;  %vm969_vm10 = vc.u32 %v967_v58, %v963_v9  ;;  %v971_v24 = vadd.s32 %v967_v58, %v963_v9 }
 0x52d   :  { %v946_v5 = vadd.s32 %v944_v3, %v938_v56  ;;  %vm947_vm9 = vc.u32 %v945_v0, %v941_v35  ;;  %v970_v14 = vsel %vm969_vm10, 1, %v3330_v28 }
 0x52e   :  { %v948_v7 = vsel %vm947_vm9, 1, %v3330_v28  ;;  %v972_v16 = vadd.s32 %v970_v14, %v968_v8  ;;  %vm1025_vm9 = vweird.f32 %v3629_v1 }
 0x52f   :  { %v950_v62 = vadd.s32 %v948_v7, %v946_v5 }
 0x530   :  { %v973_v22 = vadd.s32 %v972_v16, %v962_v46 }
 0x531   :  { %v951_v19 = vadd.s32 %v950_v62, %v940_v20 }
 0x532   :  { %v974_v25 = vadd.s32 %v973_v22, %v964_v27 }
 0x533   :  { %v952_v23 = vadd.s32 %v951_v19, %v942_v18 }
 0x534   :  { %v978_v30 = vadd.s32 1, %v974_v25 }
 0x535   :  { %vm977_vm11 = vc.u32 %v952_v23, %v971_v24  ;;  %v976_v60 = vadd.s32 %v971_v24, %v952_v23 }
 0x536   :  { %v979_v42 = vsel %vm977_vm11, %v978_v30, %v974_v25 }
 0x537   :  { %v980_v32 = vadd.s32 %v979_v42, %v975_v15 }
 0x539   :  { %v981_v45 = vadd.s32 536870912, %v980_v32 }
 0x53b   :  { %v982_v33 = vshrl.u32 %v981_v45, 30 }
 0x53d   :  { %v983_v63 = vshll.u32 %v982_v33, 30  ;;  %v1006_v0 = vsub.s32 4, %v982_v33 }
 0x53f   :  { %v984_v21 = vsub.s32 %v980_v32, %v983_v63  ;;  %v1007_v5 = vsel %vm884_vm14, %v1006_v0, %v982_v33 }
 0x540   :  { %v1009_v7 = vsel %vm883_vm1, 0, %v1007_v5 }
 0x541   :  { %vm985_vm12 = vcmp.lt.s32.totalorder %v984_v21, 0  ;;  %v986_v41 = vsub.s32 0, %v984_v21  ;;  %v1185_v14 = vadd.s32 3, %v1009_v7  ;;  %v1026_v17 = vand.u32 3, %v1009_v7 }
 0x543   :  { %v987_v4 = vsel %vm985_vm12, %v986_v41, %v984_v21  ;;  %v1186_v18 = vand.u32 3, %v1185_v14  ;;  %vm1027_vm2 = vcmp.lt.s32.totalorder %v1026_v17, 2  ;;  %vm1028_vm3 = vcmp.eq.s32.totalorder %v1026_v17, 0 }
 0x544   :  { %v988_v36 = vclz %v987_v4  ;;  %vm1031_vm4 = vcmp.eq.s32.totalorder %v1026_v17, 2 }
 0x545   :  { %vm1187_vm5 = vcmp.lt.s32.totalorder %v1186_v18, 2  ;;  %vm1188_vm6 = vcmp.eq.s32.totalorder %v1186_v18, 0  ;;  %vm1191_vm8 = vcmp.eq.s32.totalorder %v1186_v18, 2 }
 0x546   :  { %v3109_v39 = vadd.s32 4294967294, %v988_v36 }
 0x548   :  { %vm3110_vm13 = vcmp.lt.s32.totalorder %v3109_v39, 0 }
 0x549   :  { %v991_v38 = vsel %vm3110_vm13, 0, %v3109_v39  ;;  %v3204_v39 = vld [vmem:[#allocation5 + $0x18] sm:$0xff] }
 0x54a   :  { %v992_v44 = vsub.s32 32, %v991_v38  ;;  %v996_v48 = vsub.s32 4294967266, %v991_v38  ;;  %v993_v49 = vshll.u32 %v984_v21, %v991_v38  ;;  %v3206_v38 = vld [vmem:[#allocation5 + $0x8] sm:$0xff] }
 0x54c   :  { %v994_v54 = vshrl.u32 %v976_v60, %v992_v44  ;;  %v997_v51 = vadd.s32 127, %v996_v48  ;;  %v3207_v60 = vld [vmem:[#allocation5] sm:$0xff] }
 0x54e   :  { %v995_v53 = vor.u32 %v994_v54, %v993_v49  ;;  %v998_v52 = vshll.u32 %v997_v51, 23  ;;  %v3209_v49 = vld [vmem:[#allocation7 + $0x18] sm:$0xff]  ;;  %v3210_v54 = vld [vmem:[#allocation7 + $0x10] sm:$0xff]  ;;  %v3211_v51 = vld [vmem:[#allocation7 + $0x8] sm:$0xff] }
 0x550   :  { %v999_v47 = vor.u32 4788187, %v998_v52  ;;  %v1002_v56 = vcvt.s32.f32 %v995_v53  ;;  %v3212_v53 = vld [vmem:[#allocation7] sm:$0xff] }
 0x552   :  { %v1000_v55 = vand.u32 2147483647, %v999_v47  ;;  %v3712_v47 = vld [vmem:[%s4119_s4] ss:$0 sm:$0xff] }
 0x554   :  { %v1003_v57 = vmul.f32 %v1002_v56, %v1000_v55 }
 0x556   :  { %v1004_v10 = vxor.u32 2147483648, %v1003_v57 }
 0x558   :  { %v1005_v35 = vsel %vm884_vm14, %v1004_v10, %v1003_v57 }
 0x559   :  { %v1008_v2 = vsel %vm883_vm1, %v3629_v1, %v1005_v35  ;;  %v3205_v1 = vld [vmem:[#allocation5 + $0x10] sm:$0xff] }
 0x55a   :  { %v1010_v3 = vmul.f32 %v1008_v2, %v1008_v2 }
 0x55c   :  { %v1011_v9 = vmul.f32 -0.001358992, %v1010_v3  ;;  %v1018_v58 = vmul.f32 -0.00019511016, %v1010_v3 }
 0x55e   :  { %v1012_v26 = vadd.f32 0.041655596, %v1011_v9  ;;  %v1019_v6 = vadd.f32 0.008332121, %v1018_v58 }
 0x560   :  { %v1013_v8 = vmul.f32 %v1012_v26, %v1010_v3  ;;  %v1020_v61 = vmul.f32 %v1019_v6, %v1010_v3 }
 0x562   :  { %v1014_v20 = vadd.f32 -0.4999988, %v1013_v8  ;;  %v1021_v62 = vadd.f32 -0.16666654, %v1020_v61 }
 0x564   :  { %v1015_v46 = vmul.f32 %v1014_v20, %v1010_v3  ;;  %v1022_v16 = vmul.f32 %v1021_v62, %v1010_v3 }
 0x566   :  { %v1016_v11 = vadd.f32 1.0, %v1015_v46  ;;  %v1023_v59 = vadd.f32 1.0, %v1022_v16 }
 0x568   :  { %v1024_v19 = vmul.f32 %v1023_v59, %v1008_v2  ;;  %v1032_v27 = vxor.u32 2147483648, %v1016_v11 }
 0x56a   :  { %v1029_v22 = vxor.u32 2147483648, %v1024_v19  ;;  %v1033_v24 = vsel %vm1031_vm4, %v1032_v27, %v1024_v19  ;;  %v1193_v25 = vsel %vm1191_vm8, %v1032_v27, %v1024_v19 }
 0x56c   :  { %v1030_v23 = vsel %vm1028_vm3, %v1016_v11, %v1029_v22  ;;  %v1190_v13 = vsel %vm1188_vm6, %v1016_v11, %v1029_v22 }
 0x56d   :  { %v1034_v30 = vsel %vm1027_vm2, %v1030_v23, %v1033_v24  ;;  %v1194_v15 = vsel %vm1187_vm5, %v1190_v13, %v1193_v25 }
 0x56e   :  { %v1035_v42 = vsel %vm1025_vm9, nan, %v1034_v30  ;;  %v1195_v32 = vsel %vm1025_vm9, nan, %v1194_v15 }
 0x572   :  { %v1038_v45 = vpop.permute.xlu2 %1037 }
 0x573   :  { %v1040_v33 = vmul.f32 %v1038_v45, %v1035_v42  ;;  %v1196_v63 = vmul.f32 %v1195_v32, %v1038_v45 }
 0x575   :  { %v1197_v21 = vmul.f32 %v1040_v33, %v3608_v12  ;;  %v1198_v41 = vmul.f32 %v1196_v63, %v3619_v50  ;;  %v3704_v12 = vld [vmem:[%s4117_s2] ss:$0 sm:$0xff] }
 0x577   :  { %v3694_v4 = vadd.f32 %v1198_v41, %v1197_v21 }
 0x579   :  { %1206 = vrot.lane.b32.xlu0 %v3694_v4, %s3331_s12 }
 0x5eb   :  { %v1207_v36 = vpop.permute.xlu0 %1206 }
 0x5ec   :  { %3114 = vmatmul.msk.f32.vlgmr.msrb.gmra.mxu2 %vm83_vm0, %v1207_v36 }
 0x5ed   :  { %2714 = vmatpush.msrb.mxu2 %v3204_v39 }
 0x5ef   :  { %2715 = vmatpush.msrb.mxu2 %v3205_v1 }
 0x5f1   :  { %2716 = vmatpush.msrb.mxu2 %v3206_v38 }
 0x5f3   :  { %2717 = vmatpush.msrb.mxu2 %v3207_v60 }
 0x66f   :  { %v3699_v44 = vpop.f32.mrf.mxu2 }
 0x670   :  { %v1230_v50 = vadd.f32 %v3704_v12, %v3699_v44 }
 0x672   :  { %3184 = vtanh.f32 %v1230_v50 }
 0x678   :  { %v3185_v48 = vpop.eup %3184 }
 0x679   :  { %3115 = vmatmul.msk.f32.vlgmr.msrb.gmra.mxu3 %vm83_vm0, %v3185_v48 }
 0x67a   :  { %2739 = vmatpush.msrb.mxu3 %v3209_v49 }
 0x67c   :  { %2740 = vmatpush.msrb.mxu3 %v3210_v54 }
 0x67e   :  { %2741 = vmatpush.msrb.mxu3 %v3211_v51 }
 0x680   :  { %2742 = vmatpush.msrb.mxu3 %v3212_v53 }
 0x6fc   :  { %v1252_v52 = vpop.f32.mrf.mxu3 }
 0x6fd   :  { %v3715_v55 = vadd.f32 %v3712_v47, %v1252_v52 }
 0x6ff   :  { %v1260_v56 = vand.u32 2139095040, %v3715_v55  ;;  %v1255_v57 = vmul.f32 1.442695, %v3715_v55  ;;  %v1257_v0 = vand.u32 2147483647, %v3715_v55  ;;  %vm1259_vm9 = vcmp.lt.s32.totalorder %v3715_v55, 0 }
 0x701   :  { %v1261_v10 = vshrl.u32 %v1260_v56, 23  ;;  %3186 = vpow2.f32 %v1255_v57  ;;  %v1264_v58 = vand.u32 8388607, %v1257_v0 }
 0x703   :  { %v3116_v35 = vadd.s32 4294967169, %v1261_v10  ;;  %v1265_v7 = vor.u32 8388608, %v1264_v58 }
 0x705   :  { %v1267_v2 = vadd.s32 1, %v3116_v35  ;;  %v3736_v24 = vshll.u32 %v1265_v7, 8 }
 0x707   :  { %v3187_v3 = vpop.eup %3186  ;;  %vm1268_vm10 = vcmp.gt.s32.totalorder %v1267_v2, 0  ;;  %v1306_v63 = vand.u32 65535, %v3736_v24  ;;  %v1307_v21 = vshrl.u32 %v3736_v24, 16 }
 0x708   :  { %v1269_v9 = vsel %vm1268_vm10, %v1267_v2, 0  ;;  %1412 = vrot.lane.b32.xlu1 %v3187_v3, %s3323_s11  ;;  %vm1258_vm10 = vcmp.le.f32.partialorder %v1257_v0, 0.7853982 }
 0x709   :  { %v1271_v5 = vand.u32 31, %v1269_v9  ;;  %v3723_v6 = vshrl.u32 %v1269_v9, 5 }
 0x70b   :  { %v1272_v26 = vsub.s32 32, %v1271_v5  ;;  %v1274_v8 = vshll.u32 %v3324_v29, %v1271_v5  ;;  %v1277_v61 = vshll.u32 %v3325_v31, %v1271_v5  ;;  %v1280_v14 = vshll.u32 %v3326_v34, %v1271_v5 }
 0x70c   :  { %v1283_v16 = vshll.u32 %v3327_v37, %v1271_v5  ;;  %v1286_v59 = vshll.u32 %v3328_v40, %v1271_v5  ;;  %vm1289_vm11 = vcmp.lt.s32.totalorder %v3723_v6, 1  ;;  %vm1292_vm12 = vcmp.lt.s32.totalorder %v3723_v6, 4 }
 0x70d   :  { %v1275_v20 = vshrl.u32 %v3325_v31, %v1272_v26  ;;  %v1278_v62 = vshrl.u32 %v3326_v34, %v1272_v26  ;;  %v1281_v46 = vshrl.u32 %v3327_v37, %v1272_v26  ;;  %v1284_v11 = vshrl.u32 %v3328_v40, %v1272_v26 }
 0x70e   :  { %v1287_v17 = vshrl.u32 %v3329_v43, %v1272_v26  ;;  %vm1291_vm13 = vcmp.lt.s32.totalorder %v3723_v6, 3  ;;  %vm1290_vm14 = vcmp.lt.s32.totalorder %v3723_v6, 2 }
 0x70f   :  { %v1276_v18 = vor.u32 %v1275_v20, %v1274_v8  ;;  %v1279_v19 = vor.u32 %v1278_v62, %v1277_v61  ;;  %v1282_v27 = vor.u32 %v1281_v46, %v1280_v14  ;;  %v1285_v22 = vor.u32 %v1284_v11, %v1283_v16 }
 0x710   :  { %v1288_v23 = vor.u32 %v1287_v17, %v1286_v59  ;;  %v1273_v61 = vshrl.u32 %v3324_v29, %v1272_v26 }
 0x711   :  { %v1297_v13 = vsel %vm1289_vm11, %v1276_v18, %v1279_v19  ;;  %v1301_v25 = vsel %vm1289_vm11, %v1279_v19, %v1282_v27  ;;  %v1298_v30 = vsel %vm1292_vm12, %v1285_v22, 920167782  ;;  %v1294_v5 = vsel %vm1292_vm12, %v1282_v27, 2102212464 }
 0x712   :  { %v1302_v15 = vsel %vm1292_vm12, %v1288_v23, 1326507024  ;;  %v1299_v42 = vsel %vm1291_vm13, %v1282_v27, %v1298_v30  ;;  %v1293_v11 = vsel %vm1289_vm11, %v1273_v61, %v1276_v18  ;;  %v1295_v59 = vsel %vm1291_vm13, %v1279_v19, %v1294_v5 }
 0x713   :  { %v1303_v32 = vsel %vm1291_vm13, %v1285_v22, %v1302_v15  ;;  %v1300_v45 = vsel %vm1290_vm14, %v1297_v13, %v1299_v42  ;;  %v1296_v26 = vsel %vm1290_vm14, %v1293_v11, %v1295_v59 }
 0x714   :  { %v1304_v33 = vsel %vm1290_vm14, %v1301_v25, %v1303_v32  ;;  %v1330_v39 = vand.u32 65535, %v1300_v45  ;;  %v1331_v1 = vshrl.u32 %v1300_v45, 16  ;;  %v1350_v42 = vmul.u32 %v3736_v24, %v1296_v26 }
 0x715   :  { %v1308_v41 = vand.u32 65535, %v1304_v33  ;;  %v1309_v36 = vshrl.u32 %v1304_v33, 16 }
 0x716   :  { %v1333_v50 = vmul.u32 %v1331_v1, %v1306_v63  ;;  %v1334_v48 = vmul.u32 %v1330_v39, %v1307_v21  ;;  %v1332_v53 = vmul.u32 %v1330_v39, %v1306_v63  ;;  %v1335_v10 = vmul.u32 %v1331_v1, %v1307_v21 }
 0x717   :  { %v1311_v38 = vmul.u32 %v1309_v36, %v1306_v63  ;;  %v1312_v60 = vmul.u32 %v1308_v41, %v1307_v21  ;;  %v1310_v49 = vmul.u32 %v1308_v41, %v1306_v63  ;;  %v1313_v51 = vmul.u32 %v1309_v36, %v1307_v21 }
 0x718   :  { %v1336_v52 = vshll.u32 %v1333_v50, 16  ;;  %v1338_v2 = vshll.u32 %v1334_v48, 16  ;;  %v1337_v46 = vshrl.u32 %v1333_v50, 16  ;;  %v1339_v22 = vshrl.u32 %v1334_v48, 16 }
 0x719   :  { %v1314_v54 = vshll.u32 %v1311_v38, 16  ;;  %v1316_v56 = vshll.u32 %v1312_v60, 16  ;;  %v1315_v20 = vshrl.u32 %v1311_v38, 16  ;;  %v1317_v17 = vshrl.u32 %v1312_v60, 16 }
 0x71a   :  { %vm1340_vm2 = vc.u32 %v1332_v53, %v1336_v52  ;;  %v1342_v3 = vadd.s32 %v1336_v52, %v1332_v53 }
 0x71b   :  { %vm1318_vm1 = vc.u32 %v1310_v49, %v1314_v54  ;;  %v1320_v57 = vadd.s32 %v1314_v54, %v1310_v49  ;;  %v1341_v58 = vsel %vm1340_vm2, 1, %v3330_v28 }
 0x71c   :  { %v1319_v35 = vsel %vm1318_vm1, 1, %v3330_v28  ;;  %v1343_v8 = vadd.s32 %v1341_v58, %v1335_v10  ;;  %vm1344_vm4 = vc.u32 %v1342_v3, %v1338_v2  ;;  %v1346_v25 = vadd.s32 %v1342_v3, %v1338_v2 }
 0x71d   :  { %v1321_v9 = vadd.s32 %v1319_v35, %v1313_v51  ;;  %vm1322_vm3 = vc.u32 %v1320_v57, %v1316_v56  ;;  %v1345_v14 = vsel %vm1344_vm4, 1, %v3330_v28 }
 0x71e   :  { %v1323_v7 = vsel %vm1322_vm3, 1, %v3330_v28  ;;  %v1347_v16 = vadd.s32 %v1345_v14, %v1343_v8  ;;  %vm1400_vm3 = vweird.f32 %v3715_v55 }
 0x71f   :  { %v1325_v62 = vadd.s32 %v1323_v7, %v1321_v9 }
 0x720   :  { %v1348_v23 = vadd.s32 %v1347_v16, %v1337_v46 }
 0x721   :  { %v1326_v27 = vadd.s32 %v1325_v62, %v1315_v20 }
 0x722   :  { %v1349_v30 = vadd.s32 %v1348_v23, %v1339_v22 }
 0x723   :  { %v1327_v13 = vadd.s32 %v1326_v27, %v1317_v17 }
 0x724   :  { %v1353_v15 = vadd.s32 1, %v1349_v30 }
 0x725   :  { %vm1352_vm5 = vc.u32 %v1327_v13, %v1346_v25  ;;  %v1351_v6 = vadd.s32 %v1346_v25, %v1327_v13 }
 0x726   :  { %v1354_v32 = vsel %vm1352_vm5, %v1353_v15, %v1349_v30 }
 0x727   :  { %v1355_v45 = vadd.s32 %v1354_v32, %v1350_v42 }
 0x729   :  { %v1356_v18 = vadd.s32 536870912, %v1355_v45 }
 0x72b   :  { %v1357_v33 = vshrl.u32 %v1356_v18, 30 }
 0x72d   :  { %v1358_v63 = vshll.u32 %v1357_v33, 30  ;;  %v1381_v61 = vsub.s32 4, %v1357_v33 }
 0x72f   :  { %v1359_v19 = vsub.s32 %v1355_v45, %v1358_v63  ;;  %v1382_v14 = vsel %vm1259_vm9, %v1381_v61, %v1357_v33 }
 0x730   :  { %v1384_v16 = vsel %vm1258_vm10, 0, %v1382_v14 }
 0x731   :  { %vm1360_vm6 = vcmp.lt.s32.totalorder %v1359_v19, 0  ;;  %v1361_v21 = vsub.s32 0, %v1359_v19  ;;  %v1560_v17 = vadd.s32 3, %v1384_v16  ;;  %v1401_v22 = vand.u32 3, %v1384_v16 }
 0x733   :  { %v1362_v41 = vsel %vm1360_vm6, %v1361_v21, %v1359_v19  ;;  %v1561_v23 = vand.u32 3, %v1560_v17  ;;  %vm1403_vm11 = vcmp.eq.s32.totalorder %v1401_v22, 0  ;;  %vm1406_vm13 = vcmp.eq.s32.totalorder %v1401_v22, 2 }
 0x734   :  { %v1363_v36 = vclz %v1362_v41  ;;  %vm1402_vm1 = vcmp.lt.s32.totalorder %v1401_v22, 2 }
 0x735   :  { %vm1563_vm12 = vcmp.eq.s32.totalorder %v1561_v23, 0  ;;  %vm1566_vm14 = vcmp.eq.s32.totalorder %v1561_v23, 2  ;;  %vm1562_vm2 = vcmp.lt.s32.totalorder %v1561_v23, 2 }
 0x736   :  { %v3117_v39 = vadd.s32 4294967294, %v1363_v36 }
 0x738   :  { %vm3118_vm8 = vcmp.lt.s32.totalorder %v3117_v39, 0 }
 0x739   :  { %v1366_v1 = vsel %vm3118_vm8, 0, %v3117_v39 }
 0x73a   :  { %v1367_v38 = vsub.s32 32, %v1366_v1  ;;  %v1371_v60 = vsub.s32 4294967266, %v1366_v1  ;;  %v1368_v50 = vshll.u32 %v1359_v19, %v1366_v1 }
 0x73c   :  { %v1369_v48 = vshrl.u32 %v1351_v6, %v1367_v38  ;;  %v1372_v49 = vadd.s32 127, %v1371_v60 }
 0x73e   :  { %v1370_v24 = vor.u32 %v1369_v48, %v1368_v50  ;;  %v1373_v54 = vshll.u32 %v1372_v49, 23 }
 0x740   :  { %v1374_v51 = vor.u32 4788187, %v1373_v54  ;;  %v1377_v52 = vcvt.s32.f32 %v1370_v24 }
 0x742   :  { %v1375_v53 = vand.u32 2147483647, %v1374_v51 }
 0x744   :  { %v1378_v56 = vmul.f32 %v1377_v52, %v1375_v53 }
 0x746   :  { %v1379_v57 = vxor.u32 2147483648, %v1378_v56 }
 0x748   :  { %v1380_v10 = vsel %vm1259_vm9, %v1379_v57, %v1378_v56 }
 0x749   :  { %v1383_v35 = vsel %vm1258_vm10, %v3715_v55, %v1380_v10 }
 0x74a   :  { %v1385_v2 = vmul.f32 %v1383_v35, %v1383_v35 }
 0x74c   :  { %v1393_v3 = vmul.f32 -0.00019511016, %v1385_v2  ;;  %v1386_v58 = vmul.f32 -0.001358992, %v1385_v2 }
 0x74e   :  { %v1394_v9 = vadd.f32 0.008332121, %v1393_v3  ;;  %v1387_v7 = vadd.f32 0.041655596, %v1386_v58 }
 0x750   :  { %v1395_v5 = vmul.f32 %v1394_v9, %v1385_v2  ;;  %v1388_v20 = vmul.f32 %v1387_v7, %v1385_v2 }
 0x752   :  { %v1396_v8 = vadd.f32 -0.16666654, %v1395_v5  ;;  %v1389_v46 = vadd.f32 -0.4999988, %v1388_v20 }
 0x754   :  { %v1397_v62 = vmul.f32 %v1396_v8, %v1385_v2  ;;  %v1390_v59 = vmul.f32 %v1389_v46, %v1385_v2 }
 0x756   :  { %v1398_v11 = vadd.f32 1.0, %v1397_v62  ;;  %v1391_v0 = vadd.f32 1.0, %v1390_v59 }
 0x758   :  { %v1399_v27 = vmul.f32 %v1398_v11, %v1383_v35  ;;  %v1407_v25 = vxor.u32 2147483648, %v1391_v0 }
 0x75a   :  { %v1404_v13 = vxor.u32 2147483648, %v1399_v27  ;;  %v1408_v15 = vsel %vm1406_vm13, %v1407_v25, %v1399_v27  ;;  %v1568_v42 = vsel %vm1566_vm14, %v1407_v25, %v1399_v27 }
 0x75c   :  { %v1405_v26 = vsel %vm1403_vm11, %v1391_v0, %v1404_v13  ;;  %v1565_v30 = vsel %vm1563_vm12, %v1391_v0, %v1404_v13 }
 0x75d   :  { %v1409_v32 = vsel %vm1402_vm1, %v1405_v26, %v1408_v15  ;;  %v1569_v45 = vsel %vm1562_vm2, %v1565_v30, %v1568_v42 }
 0x75e   :  { %v1410_v18 = vsel %vm1400_vm3, nan, %v1409_v32  ;;  %v1570_v33 = vsel %vm1400_vm3, nan, %v1569_v45 }
 0x77a   :  { %v1413_v63 = vpop.permute.xlu1 %1412 }
 0x77b   :  { %v1415_v19 = vmul.f32 %v1413_v63, %v1410_v18  ;;  %v1571_v21 = vmul.f32 %v1570_v33, %v1413_v63 }
 0x77d   :  { %v1572_v41 = vmul.f32 %v1415_v19, %v3694_v4  ;;  %v1573_v36 = vmul.f32 %v1571_v21, %v3699_v44 }
 0x77f   :  { %v3780_v39 = vadd.f32 %v1573_v36, %v1572_v41 }
 0x781   :  { %1581 = vrot.lane.b32.xlu2 %v3780_v39, %s3331_s12 }
 0x7db   :  { %v1582_v1 = vpop.permute.xlu2 %1581 }
 0x7dc   :  { %3122 = vmatmul.msk.f32.vlgmr.msra.gmra.mxu0 %vm83_vm0, %v1582_v1 }
 0x859   :  { %v3785_v6 = vpop.f32.mrf.mxu0 }
 0x85a   :  { %v1605_v55 = vadd.f32 %v3704_v12, %v3785_v6 }
 0x85c   :  { %3188 = vtanh.f32 %v1605_v55 }
 0x862   :  { %v3189_v38 = vpop.eup %3188 }
 0x863   :  { %3123 = vmatmul.msk.f32.vlgmr.msra.gmra.mxu1 %vm83_vm0, %v3189_v38 }
 0x8e0   :  { %v1627_v60 = vpop.f32.mrf.mxu1 }
 0x8e1   :  { %v3791_v44 = vadd.f32 %v3712_v47, %v1627_v60 }
 0x8e3   :  { %v1635_v50 = vand.u32 2139095040, %v3791_v44  ;;  %v1630_v48 = vmul.f32 1.442695, %v3791_v44  ;;  %v1632_v54 = vand.u32 2147483647, %v3791_v44  ;;  %vm1634_vm3 = vcmp.lt.s32.totalorder %v3791_v44, 0 }
 0x8e5   :  { %v1636_v49 = vshrl.u32 %v1635_v50, 23  ;;  %3190 = vpow2.f32 %v1630_v48  ;;  %v1639_v56 = vand.u32 8388607, %v1632_v54 }
 0x8e7   :  { %v3124_v24 = vadd.s32 4294967169, %v1636_v49  ;;  %v1640_v2 = vor.u32 8388608, %v1639_v56 }
 0x8e9   :  { %v1642_v51 = vadd.s32 1, %v3124_v24  ;;  %v3812_v27 = vshll.u32 %v1640_v2, 8 }
 0x8eb   :  { %v3191_v53 = vpop.eup %3190  ;;  %vm1643_vm4 = vcmp.gt.s32.totalorder %v1642_v51, 0  ;;  %v1681_v42 = vand.u32 65535, %v3812_v27  ;;  %v1682_v32 = vshrl.u32 %v3812_v27, 16 }
 0x8ec   :  { %v1644_v52 = vsel %vm1643_vm4, %v1642_v51, 0  ;;  %1787 = vrot.lane.b32.xlu0 %v3191_v53, %s3323_s11  ;;  %vm1633_vm4 = vcmp.le.f32.partialorder %v1632_v54, 0.7853982 }
 0x8ed   :  { %v1646_v57 = vand.u32 31, %v1644_v52  ;;  %v3799_v35 = vshrl.u32 %v1644_v52, 5 }
 0x8ef   :  { %v1647_v10 = vsub.s32 32, %v1646_v57  ;;  %v1649_v3 = vshll.u32 %v3324_v29, %v1646_v57  ;;  %v1652_v9 = vshll.u32 %v3325_v31, %v1646_v57  ;;  %v1655_v7 = vshll.u32 %v3326_v34, %v1646_v57 }
 0x8f0   :  { %v1658_v61 = vshll.u32 %v3327_v37, %v1646_v57  ;;  %v1661_v62 = vshll.u32 %v3328_v40, %v1646_v57  ;;  %vm1664_vm5 = vcmp.lt.s32.totalorder %v3799_v35, 1  ;;  %vm1667_vm6 = vcmp.lt.s32.totalorder %v3799_v35, 4 }
 0x8f1   :  { %v1650_v58 = vshrl.u32 %v3325_v31, %v1647_v10  ;;  %v1653_v5 = vshrl.u32 %v3326_v34, %v1647_v10  ;;  %v1656_v8 = vshrl.u32 %v3327_v37, %v1647_v10  ;;  %v1659_v20 = vshrl.u32 %v3328_v40, %v1647_v10 }
 0x8f2   :  { %v1662_v14 = vshrl.u32 %v3329_v43, %v1647_v10  ;;  %vm1666_vm8 = vcmp.lt.s32.totalorder %v3799_v35, 3  ;;  %vm1665_vm9 = vcmp.lt.s32.totalorder %v3799_v35, 2 }
 0x8f3   :  { %v1651_v46 = vor.u32 %v1650_v58, %v1649_v3  ;;  %v1654_v16 = vor.u32 %v1653_v5, %v1652_v9  ;;  %v1657_v11 = vor.u32 %v1656_v8, %v1655_v7  ;;  %v1660_v59 = vor.u32 %v1659_v20, %v1658_v61 }
 0x8f4   :  { %v1663_v17 = vor.u32 %v1662_v14, %v1661_v62  ;;  %v1648_v58 = vshrl.u32 %v3324_v29, %v1647_v10 }
 0x8f5   :  { %v1672_v0 = vsel %vm1664_vm5, %v1651_v46, %v1654_v16  ;;  %v1676_v22 = vsel %vm1664_vm5, %v1654_v16, %v1657_v11  ;;  %v1673_v23 = vsel %vm1667_vm6, %v1660_v59, 920167782  ;;  %v1669_v2 = vsel %vm1667_vm6, %v1657_v11, 2102212464 }
 0x8f6   :  { %v1677_v13 = vsel %vm1667_vm6, %v1663_v17, 1326507024  ;;  %v1674_v25 = vsel %vm1666_vm8, %v1657_v11, %v1673_v23  ;;  %v1668_v62 = vsel %vm1664_vm5, %v1648_v58, %v1651_v46  ;;  %v1670_v14 = vsel %vm1666_vm8, %v1654_v16, %v1669_v2 }
 0x8f7   :  { %v1678_v26 = vsel %vm1666_vm8, %v1660_v59, %v1677_v13  ;;  %v1675_v30 = vsel %vm1665_vm9, %v1672_v0, %v1674_v25  ;;  %v1671_v10 = vsel %vm1665_vm9, %v1668_v62, %v1670_v14 }
 0x8f8   :  { %v1679_v15 = vsel %vm1665_vm9, %v1676_v22, %v1678_v26  ;;  %v1705_v33 = vand.u32 65535, %v1675_v30  ;;  %v1706_v63 = vshrl.u32 %v1675_v30, 16  ;;  %v1725_v26 = vmul.u32 %v3812_v27, %v1671_v10 }
 0x8f9   :  { %v1683_v45 = vand.u32 65535, %v1679_v15  ;;  %v1684_v18 = vshrl.u32 %v1679_v15, 16 }
 0x8fa   :  { %v1708_v41 = vmul.u32 %v1706_v63, %v1681_v42  ;;  %v1709_v36 = vmul.u32 %v1705_v33, %v1682_v32  ;;  %v1707_v60 = vmul.u32 %v1705_v33, %v1681_v42  ;;  %v1710_v24 = vmul.u32 %v1706_v63, %v1682_v32 }
 0x8fb   :  { %v1686_v19 = vmul.u32 %v1684_v18, %v1681_v42  ;;  %v1687_v21 = vmul.u32 %v1683_v45, %v1682_v32  ;;  %v1685_v1 = vmul.u32 %v1683_v45, %v1681_v42  ;;  %v1688_v38 = vmul.u32 %v1684_v18, %v1682_v32 }
 0x8fc   :  { %v1711_v50 = vshll.u32 %v1708_v41, 16  ;;  %v1713_v53 = vshll.u32 %v1709_v36, 16  ;;  %v1712_v61 = vshrl.u32 %v1708_v41, 16  ;;  %v1714_v17 = vshrl.u32 %v1709_v36, 16 }
 0x8fd   :  { %v1689_v55 = vshll.u32 %v1686_v19, 16  ;;  %v1691_v48 = vshll.u32 %v1687_v21, 16  ;;  %v1690_v5 = vshrl.u32 %v1686_v19, 16  ;;  %v1692_v59 = vshrl.u32 %v1687_v21, 16 }
 0x8fe   :  { %vm1715_vm11 = vc.u32 %v1707_v60, %v1711_v50  ;;  %v1717_v52 = vadd.s32 %v1711_v50, %v1707_v60 }
 0x8ff   :  { %vm1693_vm10 = vc.u32 %v1685_v1, %v1689_v55  ;;  %v1695_v49 = vadd.s32 %v1689_v55, %v1685_v1  ;;  %v1716_v57 = vsel %vm1715_vm11, 1, %v3330_v28 }
 0x900   :  { %v1694_v51 = vsel %vm1693_vm10, 1, %v3330_v28  ;;  %v1718_v9 = vadd.s32 %v1716_v57, %v1710_v24  ;;  %vm1719_vm13 = vc.u32 %v1717_v52, %v1713_v53  ;;  %v1721_v23 = vadd.s32 %v1717_v52, %v1713_v53 }
 0x901   :  { %v1696_v56 = vadd.s32 %v1694_v51, %v1688_v38  ;;  %vm1697_vm12 = vc.u32 %v1695_v49, %v1691_v48  ;;  %v1720_v8 = vsel %vm1719_vm13, 1, %v3330_v28 }
 0x902   :  { %v1698_v3 = vsel %vm1697_vm12, 1, %v3330_v28  ;;  %v1722_v20 = vadd.s32 %v1720_v8, %v1718_v9  ;;  %vm1775_vm12 = vweird.f32 %v3791_v44 }
 0x903   :  { %v1700_v7 = vadd.s32 %v1698_v3, %v1696_v56 }
 0x904   :  { %v1723_v0 = vadd.s32 %v1722_v20, %v1712_v61 }
 0x905   :  { %v1701_v11 = vadd.s32 %v1700_v7, %v1690_v5 }
 0x906   :  { %v1724_v13 = vadd.s32 %v1723_v0, %v1714_v17 }
 0x907   :  { %v1702_v22 = vadd.s32 %v1701_v11, %v1692_v59 }
 0x908   :  { %v1728_v25 = vadd.s32 1, %v1724_v13 }
 0x909   :  { %vm1727_vm14 = vc.u32 %v1702_v22, %v1721_v23  ;;  %v1726_v35 = vadd.s32 %v1721_v23, %v1702_v22 }
 0x90a   :  { %v1729_v30 = vsel %vm1727_vm14, %v1728_v25, %v1724_v13 }
 0x90b   :  { %v1730_v15 = vadd.s32 %v1729_v30, %v1725_v26 }
 0x90d   :  { %v1731_v46 = vadd.s32 536870912, %v1730_v15 }
 0x90f   :  { %v1732_v42 = vshrl.u32 %v1731_v46, 30 }
 0x911   :  { %v1733_v32 = vshll.u32 %v1732_v42, 30  ;;  %v1756_v5 = vsub.s32 4, %v1732_v42 }
 0x913   :  { %v1734_v16 = vsub.s32 %v1730_v15, %v1733_v32  ;;  %v1757_v61 = vsel %vm1634_vm3, %v1756_v5, %v1732_v42 }
 0x914   :  { %v1759_v62 = vsel %vm1633_vm4, 0, %v1757_v61 }
 0x915   :  { %vm1735_vm1 = vcmp.lt.s32.totalorder %v1734_v16, 0  ;;  %v1736_v45 = vsub.s32 0, %v1734_v16  ;;  %v1935_v11 = vadd.s32 3, %v1759_v62  ;;  %v1776_v0 = vand.u32 3, %v1759_v62 }
 0x917   :  { %v1737_v18 = vsel %vm1735_vm1, %v1736_v45, %v1734_v16  ;;  %v1936_v22 = vand.u32 3, %v1935_v11  ;;  %vm1778_vm5 = vcmp.eq.s32.totalorder %v1776_v0, 0  ;;  %vm1781_vm8 = vcmp.eq.s32.totalorder %v1776_v0, 2 }
 0x918   :  { %v1738_v33 = vclz %v1737_v18  ;;  %vm1777_vm10 = vcmp.lt.s32.totalorder %v1776_v0, 2 }
 0x919   :  { %vm1938_vm6 = vcmp.eq.s32.totalorder %v1936_v22, 0  ;;  %vm1941_vm9 = vcmp.eq.s32.totalorder %v1936_v22, 2  ;;  %vm1937_vm11 = vcmp.lt.s32.totalorder %v1936_v22, 2 }
 0x91a   :  { %v3125_v63 = vadd.s32 4294967294, %v1738_v33 }
 0x91c   :  { %vm3126_vm2 = vcmp.lt.s32.totalorder %v3125_v63, 0 }
 0x91d   :  { %v1741_v19 = vsel %vm3126_vm2, 0, %v3125_v63 }
 0x91e   :  { %v1742_v21 = vsub.s32 32, %v1741_v19  ;;  %v1746_v41 = vsub.s32 4294967266, %v1741_v19  ;;  %v1743_v36 = vshll.u32 %v1734_v16, %v1741_v19 }
 0x920   :  { %v1744_v1 = vshrl.u32 %v1726_v35, %v1742_v21  ;;  %v1747_v55 = vadd.s32 127, %v1746_v41 }
 0x922   :  { %v1745_v27 = vor.u32 %v1744_v1, %v1743_v36  ;;  %v1748_v38 = vshll.u32 %v1747_v55, 23 }
 0x924   :  { %v1749_v60 = vor.u32 4788187, %v1748_v38  ;;  %v1752_v48 = vcvt.s32.f32 %v1745_v27 }
 0x926   :  { %v1750_v50 = vand.u32 2147483647, %v1749_v60 }
 0x928   :  { %v1753_v49 = vmul.f32 %v1752_v48, %v1750_v50 }
 0x92a   :  { %v1754_v24 = vxor.u32 2147483648, %v1753_v49 }
 0x92c   :  { %v1755_v51 = vsel %vm1634_vm3, %v1754_v24, %v1753_v49 }
 0x92d   :  { %v1758_v53 = vsel %vm1633_vm4, %v3791_v44, %v1755_v51 }
 0x92e   :  { %v1760_v52 = vmul.f32 %v1758_v53, %v1758_v53 }
 0x930   :  { %v1768_v56 = vmul.f32 -0.00019511016, %v1760_v52  ;;  %v1761_v2 = vmul.f32 -0.001358992, %v1760_v52 }
 0x932   :  { %v1769_v57 = vadd.f32 0.008332121, %v1768_v56  ;;  %v1762_v9 = vadd.f32 0.041655596, %v1761_v2 }
 0x934   :  { %v1770_v3 = vmul.f32 %v1769_v57, %v1760_v52  ;;  %v1763_v7 = vmul.f32 %v1762_v9, %v1760_v52 }
 0x936   :  { %v1771_v58 = vadd.f32 -0.16666654, %v1770_v3  ;;  %v1764_v20 = vadd.f32 -0.4999988, %v1763_v7 }
 0x938   :  { %v1772_v8 = vmul.f32 %v1771_v58, %v1760_v52  ;;  %v1765_v59 = vmul.f32 %v1764_v20, %v1760_v52 }
 0x93a   :  { %v1773_v14 = vadd.f32 1.0, %v1772_v8  ;;  %v1766_v54 = vadd.f32 1.0, %v1765_v59 }
 0x93c   :  { %v1774_v17 = vmul.f32 %v1773_v14, %v1758_v53  ;;  %v1782_v10 = vxor.u32 2147483648, %v1766_v54 }
 0x93e   :  { %v1779_v23 = vxor.u32 2147483648, %v1774_v17  ;;  %v1783_v26 = vsel %vm1781_vm8, %v1782_v10, %v1774_v17  ;;  %v1943_v30 = vsel %vm1941_vm9, %v1782_v10, %v1774_v17 }
 0x940   :  { %v1780_v13 = vsel %vm1778_vm5, %v1766_v54, %v1779_v23  ;;  %v1940_v25 = vsel %vm1938_vm6, %v1766_v54, %v1779_v23 }
 0x941   :  { %v1784_v15 = vsel %vm1777_vm10, %v1780_v13, %v1783_v26  ;;  %v1944_v46 = vsel %vm1937_vm11, %v1940_v25, %v1943_v30 }
 0x942   :  { %v1785_v42 = vsel %vm1775_vm12, nan, %v1784_v15  ;;  %v1945_v32 = vsel %vm1775_vm12, nan, %v1944_v46 }
 0x95e   :  { %v1788_v16 = vpop.permute.xlu0 %1787 }
 0x95f   :  { %v1790_v45 = vmul.f32 %v1788_v16, %v1785_v42  ;;  %v1946_v18 = vmul.f32 %v1945_v32, %v1788_v16 }
 0x961   :  { %v1947_v33 = vmul.f32 %v1790_v45, %v3780_v39  ;;  %v1948_v63 = vmul.f32 %v1946_v18, %v3785_v6 }
 0x963   :  { %v3856_v19 = vadd.f32 %v1948_v63, %v1947_v33 }
 0x965   :  { %1951 = vrot.lane.b32.xlu1 %v3856_v19, %s3331_s12 }
 0x9d7   :  { %v1952_v35 = vpop.permute.xlu1 %1951 }
 0x9d8   :  { %1954 = vst.msk [vmem:[#allocation8 + $0x2] sm:$0x3] %vm459_vm7, %v1952_v35  ;;  %3130 = vmatmul.msk.f32.vlgmr.msra.gmra.mxu2 %vm83_vm0, %v1952_v35 }
 0xa5b   :  { %v3862_v44 = vpop.f32.mrf.mxu2 }
 0xa5c   :  { %v1977_v21 = vadd.f32 %v3704_v12, %v3862_v44 }
 0xa5e   :  { %3192 = vtanh.f32 %v1977_v21 }
 0xa64   :  { %v3193_v41 = vpop.eup %3192 }
 0xa65   :  { %3131 = vmatmul.msk.f32.vlgmr.msra.gmra.mxu3 %vm83_vm0, %v3193_v41 }
 0xae8   :  { %v1999_v6 = vpop.f32.mrf.mxu3 }
 0xae9   :  { %v3868_v36 = vadd.f32 %v3712_v47, %v1999_v6 }
 0xaeb   :  { %v2007_v1 = vand.u32 2139095040, %v3868_v36  ;;  %v2002_v55 = vmul.f32 1.442695, %v3868_v36  ;;  %v2004_v60 = vand.u32 2147483647, %v3868_v36  ;;  %vm2006_vm11 = vcmp.lt.s32.totalorder %v3868_v36, 0 }
 0xaed   :  { %v2008_v27 = vshrl.u32 %v2007_v1, 23  ;;  %3194 = vpow2.f32 %v2002_v55  ;;  %v2011_v49 = vand.u32 8388607, %v2004_v60  ;;  %vm2005_vm12 = vcmp.le.f32.partialorder %v2004_v60, 0.7853982 }
 0xaef   :  { %v3132_v38 = vadd.s32 4294967169, %v2008_v27  ;;  %v2012_v53 = vor.u32 8388608, %v2011_v49 }
 0xaf1   :  { %v2014_v50 = vadd.s32 1, %v3132_v38  ;;  %v3889_v11 = vshll.u32 %v2012_v53, 8 }
 0xaf3   :  { %v3195_v48 = vpop.eup %3194  ;;  %vm2015_vm7 = vcmp.gt.s32.totalorder %v2014_v50, 0  ;;  %v2053_v26 = vand.u32 65535, %v3889_v11  ;;  %v2054_v30 = vshrl.u32 %v3889_v11, 16 }
 0xaf4   :  { %v2016_v12 = vsel %vm2015_vm7, %v2014_v50, 0  ;;  %2159 = vrot.lane.b32.xlu2 %v3195_v48, %s3323_s11 }
 0xaf5   :  { %v2018_v47 = vand.u32 31, %v2016_v12  ;;  %v3876_v51 = vshrl.u32 %v2016_v12, 5 }
 0xaf7   :  { %v2019_v24 = vsub.s32 32, %v2018_v47  ;;  %v2021_v52 = vshll.u32 %v3324_v29, %v2018_v47  ;;  %v2024_v56 = vshll.u32 %v3325_v31, %v2018_v47  ;;  %v2027_v3 = vshll.u32 %v3326_v34, %v2018_v47 }
 0xaf8   :  { %v2030_v58 = vshll.u32 %v3327_v37, %v2018_v47  ;;  %v2033_v7 = vshll.u32 %v3328_v40, %v2018_v47  ;;  %vm2036_vm13 = vcmp.lt.s32.totalorder %v3876_v51, 1  ;;  %vm2039_vm14 = vcmp.lt.s32.totalorder %v3876_v51, 4 }
 0xaf9   :  { %v2022_v57 = vshrl.u32 %v3325_v31, %v2019_v24  ;;  %v2025_v2 = vshrl.u32 %v3326_v34, %v2019_v24  ;;  %v2028_v9 = vshrl.u32 %v3327_v37, %v2019_v24  ;;  %v2031_v5 = vshrl.u32 %v3328_v40, %v2019_v24 }
 0xafa   :  { %v2034_v8 = vshrl.u32 %v3329_v43, %v2019_v24  ;;  %vm2038_vm1 = vcmp.lt.s32.totalorder %v3876_v51, 3  ;;  %vm2037_vm2 = vcmp.lt.s32.totalorder %v3876_v51, 2 }
 0xafb   :  { %v2023_v61 = vor.u32 %v2022_v57, %v2021_v52  ;;  %v2026_v20 = vor.u32 %v2025_v2, %v2024_v56  ;;  %v2029_v62 = vor.u32 %v2028_v9, %v2027_v3  ;;  %v2032_v14 = vor.u32 %v2031_v5, %v2030_v58 }
 0xafc   :  { %v2035_v59 = vor.u32 %v2034_v8, %v2033_v7  ;;  %v2020_v56 = vshrl.u32 %v3324_v29, %v2019_v24 }
 0xafd   :  { %v2044_v17 = vsel %vm2036_vm13, %v2023_v61, %v2026_v20  ;;  %v2048_v54 = vsel %vm2036_vm13, %v2026_v20, %v2029_v62  ;;  %v2045_v0 = vsel %vm2039_vm14, %v2032_v14, 920167782  ;;  %v2041_v47 = vsel %vm2039_vm14, %v2029_v62, 2102212464 }
 0xafe   :  { %v2049_v22 = vsel %vm2039_vm14, %v2035_v59, 1326507024  ;;  %v2046_v23 = vsel %vm2038_vm1, %v2029_v62, %v2045_v0  ;;  %v2040_v5 = vsel %vm2036_vm13, %v2020_v56, %v2023_v61  ;;  %v2042_v7 = vsel %vm2038_vm1, %v2026_v20, %v2041_v47 }
 0xaff   :  { %v2050_v10 = vsel %vm2038_vm1, %v2032_v14, %v2049_v22  ;;  %v2047_v13 = vsel %vm2037_vm2, %v2044_v17, %v2046_v23  ;;  %v2043_v24 = vsel %vm2037_vm2, %v2040_v5, %v2042_v7 }
 0xb00   :  { %v2051_v25 = vsel %vm2037_vm2, %v2048_v54, %v2050_v10  ;;  %v2077_v42 = vand.u32 65535, %v2047_v13  ;;  %v2078_v32 = vshrl.u32 %v2047_v13, 16  ;;  %v2097_v23 = vmul.u32 %v3889_v11, %v2043_v24 }
 0xb01   :  { %v2055_v15 = vand.u32 65535, %v2051_v25  ;;  %v2056_v46 = vshrl.u32 %v2051_v25, 16 }
 0xb02   :  { %v2080_v18 = vmul.u32 %v2078_v32, %v2053_v26  ;;  %v2081_v33 = vmul.u32 %v2077_v42, %v2054_v30  ;;  %v2079_v41 = vmul.u32 %v2077_v42, %v2053_v26  ;;  %v2082_v27 = vmul.u32 %v2078_v32, %v2054_v30 }
 0xb03   :  { %v2058_v16 = vmul.u32 %v2056_v46, %v2053_v26  ;;  %v2059_v45 = vmul.u32 %v2055_v15, %v2054_v30  ;;  %v2057_v63 = vmul.u32 %v2055_v15, %v2053_v26  ;;  %v2060_v21 = vmul.u32 %v2056_v46, %v2054_v30 }
 0xb04   :  { %v2083_v6 = vshll.u32 %v2080_v18, 16  ;;  %v2085_v50 = vshll.u32 %v2081_v33, 16  ;;  %v2084_v9 = vshrl.u32 %v2080_v18, 16  ;;  %v2086_v14 = vshrl.u32 %v2081_v33, 16 }
 0xb05   :  { %v2061_v35 = vshll.u32 %v2058_v16, 16  ;;  %v2063_v1 = vshll.u32 %v2059_v45, 16  ;;  %v2062_v57 = vshrl.u32 %v2058_v16, 16  ;;  %v2064_v8 = vshrl.u32 %v2059_v45, 16 }
 0xb06   :  { %vm2087_vm4 = vc.u32 %v2079_v41, %v2083_v6  ;;  %v2089_v48 = vadd.s32 %v2083_v6, %v2079_v41 }
 0xb07   :  { %vm2065_vm3 = vc.u32 %v2057_v63, %v2061_v35  ;;  %v2067_v55 = vadd.s32 %v2061_v35, %v2057_v63  ;;  %v2088_v49 = vsel %vm2087_vm4, 1, %v3330_v28  ;;  %vm2147_vm4 = vweird.f32 %v3868_v36 }
 0xb08   :  { %v2066_v38 = vsel %vm2065_vm3, 1, %v3330_v28  ;;  %v2090_v52 = vadd.s32 %v2088_v49, %v2082_v27  ;;  %vm2091_vm6 = vc.u32 %v2089_v48, %v2085_v50  ;;  %v2093_v54 = vadd.s32 %v2089_v48, %v2085_v50 }
 0xb09   :  { %v2068_v12 = vadd.s32 %v2066_v38, %v2060_v21  ;;  %vm2069_vm5 = vc.u32 %v2067_v55, %v2063_v1  ;;  %v2092_v3 = vsel %vm2091_vm6, 1, %v3330_v28 }
 0xb0a   :  { %v2070_v53 = vsel %vm2069_vm5, 1, %v3330_v28  ;;  %v2094_v58 = vadd.s32 %v2092_v3, %v2090_v52 }
 0xb0b   :  { %v2072_v2 = vadd.s32 %v2070_v53, %v2068_v12 }
 0xb0c   :  { %v2095_v59 = vadd.s32 %v2094_v58, %v2084_v9 }
 0xb0d   :  { %v2073_v62 = vadd.s32 %v2072_v2, %v2062_v57 }
 0xb0e   :  { %v2096_v0 = vadd.s32 %v2095_v59, %v2086_v14 }
 0xb0f   :  { %v2074_v17 = vadd.s32 %v2073_v62, %v2064_v8 }
 0xb10   :  { %v2100_v22 = vadd.s32 1, %v2096_v0 }
 0xb11   :  { %vm2099_vm8 = vc.u32 %v2074_v17, %v2093_v54  ;;  %v2098_v51 = vadd.s32 %v2093_v54, %v2074_v17 }
 0xb12   :  { %v2101_v10 = vsel %vm2099_vm8, %v2100_v22, %v2096_v0 }
 0xb13   :  { %v2102_v13 = vadd.s32 %v2101_v10, %v2097_v23 }
 0xb15   :  { %v2103_v61 = vadd.s32 536870912, %v2102_v13 }
 0xb17   :  { %v2104_v25 = vshrl.u32 %v2103_v61, 30 }
 0xb19   :  { %v2105_v26 = vshll.u32 %v2104_v25, 30  ;;  %v2128_v38 = vsub.s32 4, %v2104_v25 }
 0xb1b   :  { %v2106_v20 = vsub.s32 %v2102_v13, %v2105_v26  ;;  %v2129_v47 = vsel %vm2006_vm11, %v2128_v38, %v2104_v25 }
 0xb1c   :  { %v2131_v56 = vsel %vm2005_vm12, 0, %v2129_v47 }
 0xb1d   :  { %vm2107_vm9 = vcmp.lt.s32.totalorder %v2106_v20, 0  ;;  %v2108_v30 = vsub.s32 0, %v2106_v20  ;;  %v2307_v58 = vadd.s32 3, %v2131_v56  ;;  %v2148_v62 = vand.u32 3, %v2131_v56 }
 0xb1f   :  { %v2109_v15 = vsel %vm2107_vm9, %v2108_v30, %v2106_v20  ;;  %v2308_v14 = vand.u32 3, %v2307_v58  ;;  %vm2149_vm7 = vcmp.lt.s32.totalorder %v2148_v62, 2  ;;  %vm2150_vm13 = vcmp.eq.s32.totalorder %v2148_v62, 0 }
 0xb20   :  { %v2110_v46 = vclz %v2109_v15  ;;  %vm2153_vm14 = vcmp.eq.s32.totalorder %v2148_v62, 2 }
 0xb21   :  { %vm2309_vm1 = vcmp.lt.s32.totalorder %v2308_v14, 2  ;;  %vm2310_vm2 = vcmp.eq.s32.totalorder %v2308_v14, 0  ;;  %vm2313_vm3 = vcmp.eq.s32.totalorder %v2308_v14, 2 }
 0xb22   :  { %v3133_v42 = vadd.s32 4294967294, %v2110_v46 }
 0xb24   :  { %vm3134_vm10 = vcmp.lt.s32.totalorder %v3133_v42, 0 }
 0xb25   :  { %v2113_v32 = vsel %vm3134_vm10, 0, %v3133_v42 }
 0xb26   :  { %v2114_v16 = vsub.s32 32, %v2113_v32  ;;  %v2118_v45 = vsub.s32 4294967266, %v2113_v32  ;;  %v2115_v18 = vshll.u32 %v2106_v20, %v2113_v32 }
 0xb28   :  { %v2116_v33 = vshrl.u32 %v2098_v51, %v2114_v16  ;;  %v2119_v63 = vadd.s32 127, %v2118_v45  ;;  %v3945_v51 = vld [vmem:[%s4117_s2] ss:$0 sm:$0xff]  ;;  %s3332_s2 = smov 64  }
 0xb29   :  { %v3953_v45 = vld [vmem:[%s4119_s4] ss:$0 sm:$0xff]  ;;  %s3333_s4 = smov [#allocation8]  }
 0xb2a   :  { %v2117_v11 = vor.u32 %v2116_v33, %v2115_v18  ;;  %v2120_v35 = vshll.u32 %v2119_v63, 23  ;;  %s3077_s21 = sshll.u32 %s3333_s4, 4  ;;  %s3078_s21 = int_to_ptr.vmem [resolvable:$true] %s3077_s21 }
 0xb2c   :  { %v2121_v21 = vor.u32 4788187, %v2120_v35  ;;  %v2124_v6 = vcvt.s32.f32 %v2117_v11 }
 0xb2e   :  { %v2122_v41 = vand.u32 2147483647, %v2121_v21 }
 0xb30   :  { %v2125_v1 = vmul.f32 %v2124_v6, %v2122_v41 }
 0xb32   :  { %v2126_v55 = vxor.u32 2147483648, %v2125_v1 }
 0xb34   :  { %v2127_v27 = vsel %vm2006_vm11, %v2126_v55, %v2125_v1 }
 0xb35   :  { %v2130_v50 = vsel %vm2005_vm12, %v3868_v36, %v2127_v27 }
 0xb36   :  { %v2132_v48 = vmul.f32 %v2130_v50, %v2130_v50 }
 0xb38   :  { %v2133_v12 = vmul.f32 -0.001358992, %v2132_v48  ;;  %v2140_v49 = vmul.f32 -0.00019511016, %v2132_v48 }
 0xb3a   :  { %v2134_v53 = vadd.f32 0.041655596, %v2133_v12  ;;  %v2141_v52 = vadd.f32 0.008332121, %v2140_v49 }
 0xb3c   :  { %v2135_v57 = vmul.f32 %v2134_v53, %v2132_v48  ;;  %v2142_v2 = vmul.f32 %v2141_v52, %v2132_v48 }
 0xb3e   :  { %v2136_v3 = vadd.f32 -0.4999988, %v2135_v57  ;;  %v2143_v9 = vadd.f32 -0.16666654, %v2142_v2 }
 0xb40   :  { %v2137_v5 = vmul.f32 %v2136_v3, %v2132_v48  ;;  %v2144_v7 = vmul.f32 %v2143_v9, %v2132_v48 }
 0xb42   :  { %v2138_v8 = vadd.f32 1.0, %v2137_v5  ;;  %v2145_v60 = vadd.f32 1.0, %v2144_v7 }
 0xb44   :  { %v2146_v59 = vmul.f32 %v2145_v60, %v2130_v50  ;;  %v2154_v17 = vxor.u32 2147483648, %v2138_v8 }
 0xb46   :  { %v2151_v54 = vxor.u32 2147483648, %v2146_v59  ;;  %v2155_v0 = vsel %vm2153_vm14, %v2154_v17, %v2146_v59  ;;  %v2315_v23 = vsel %vm2313_vm3, %v2154_v17, %v2146_v59 }
 0xb48   :  { %v2152_v24 = vsel %vm2150_vm13, %v2138_v8, %v2151_v54  ;;  %v2312_v22 = vsel %vm2310_vm2, %v2138_v8, %v2151_v54 }
 0xb49   :  { %v2156_v10 = vsel %vm2149_vm7, %v2152_v24, %v2155_v0  ;;  %v2316_v13 = vsel %vm2309_vm1, %v2312_v22, %v2315_v23 }
 0xb4a   :  { %v2157_v61 = vsel %vm2147_vm4, nan, %v2156_v10  ;;  %v2317_v25 = vsel %vm2147_vm4, nan, %v2316_v13 }
 0xb4e   :  { %v2160_v26 = vpop.permute.xlu2 %2159 }
 0xb4f   :  { %v2162_v20 = vmul.f32 %v2160_v26, %v2157_v61  ;;  %v2318_v30 = vmul.f32 %v2317_v25, %v2160_v26 }
 0xb51   :  { %v2319_v15 = vmul.f32 %v2162_v20, %v3856_v19  ;;  %v2320_v46 = vmul.f32 %v2318_v30, %v3862_v44 }
 0xb53   :  { %v3933_v42 = vadd.f32 %v2320_v46, %v2319_v15 }
 0xb55   :  { %2324 = vrot.lane.b32.xlu0 %v3933_v42, %s3331_s12  ;;  %2322 = vst.msk [vmem:[#allocation8 + $0x2] sm:$0x3] %vm828_vm15, %v3933_v42 }
 0xbc7   :  { %v2325_v32 = vpop.permute.xlu0 %2324 }
 0xbc8   :  { %3138 = vmatmul.msk.f32.vlgmr.msrb.gmra.mxu0 %vm83_vm0, %v2325_v32 }
 0xc45   :  { %v3940_v36 = vpop.f32.mrf.mxu0 }
 0xc46   :  { %v2348_v19 = vadd.f32 %v3945_v51, %v3940_v36 }
 0xc48   :  { %3196 = vtanh.f32 %v2348_v19 }
 0xc4e   :  { %v3197_v44 = vpop.eup %3196 }
 0xc4f   :  { %3139 = vmatmul.msk.f32.vlgmr.msrb.gmra.mxu1 %vm83_vm0, %v3197_v44 }
 0xccc   :  { %v2370_v16 = vpop.f32.mrf.mxu1 }
 0xccd   :  { %v3956_v18 = vadd.f32 %v3953_v45, %v2370_v16 }
 0xccf   :  { %v2378_v33 = vand.u32 2139095040, %v3956_v18  ;;  %v2373_v63 = vmul.f32 1.442695, %v3956_v18  ;;  %v2375_v21 = vand.u32 2147483647, %v3956_v18  ;;  %vm2377_vm2 = vcmp.lt.s32.totalorder %v3956_v18, 0 }
 0xcd1   :  { %v2379_v11 = vshrl.u32 %v2378_v33, 23  ;;  %3198 = vpow2.f32 %v2373_v63  ;;  %v2382_v55 = vand.u32 8388607, %v2375_v21  ;;  %vm2376_vm3 = vcmp.le.f32.partialorder %v2375_v21, 0.7853982 }
 0xcd3   :  { %v3140_v35 = vadd.s32 4294967169, %v2379_v11  ;;  %v2383_v48 = vor.u32 8388608, %v2382_v55 }
 0xcd5   :  { %v2385_v41 = vadd.s32 1, %v3140_v35  ;;  %v3979_v62 = vshll.u32 %v2383_v48, 8 }
 0xcd7   :  { %v3199_v6 = vpop.eup %3198  ;;  %vm2386_vm15 = vcmp.gt.s32.totalorder %v2385_v41, 0  ;;  %v2424_v23 = vand.u32 65535, %v3979_v62  ;;  %v2425_v10 = vshrl.u32 %v3979_v62, 16 }
 0xcd8   :  { %v2387_v1 = vsel %vm2386_vm15, %v2385_v41, 0  ;;  %2530 = vrot.lane.b32.xlu1 %v3199_v6, %s3323_s11 }
 0xcd9   :  { %v2389_v27 = vand.u32 31, %v2387_v1  ;;  %v3964_v50 = vshrl.u32 %v2387_v1, 5 }
 0xcdb   :  { %v2390_v38 = vsub.s32 32, %v2389_v27  ;;  %v2392_v12 = vshll.u32 %v3324_v29, %v2389_v27  ;;  %v2395_v49 = vshll.u32 %v3325_v31, %v2389_v27  ;;  %v2398_v52 = vshll.u32 %v3326_v34, %v2389_v27 }
 0xcdc   :  { %v2401_v57 = vshll.u32 %v3327_v37, %v2389_v27  ;;  %v2404_v3 = vshll.u32 %v3328_v40, %v2389_v27  ;;  %vm2407_vm5 = vcmp.lt.s32.totalorder %v3964_v50, 1  ;;  %vm2410_vm6 = vcmp.lt.s32.totalorder %v3964_v50, 4 }
 0xcdd   :  { %v2393_v47 = vshrl.u32 %v3325_v31, %v2390_v38  ;;  %v2396_v53 = vshrl.u32 %v3326_v34, %v2390_v38  ;;  %v2399_v56 = vshrl.u32 %v3327_v37, %v2390_v38  ;;  %v2402_v2 = vshrl.u32 %v3328_v40, %v2390_v38 }
 0xcde   :  { %v2405_v9 = vshrl.u32 %v3329_v43, %v2390_v38  ;;  %vm2409_vm8 = vcmp.lt.s32.totalorder %v3964_v50, 3  ;;  %vm2408_vm9 = vcmp.lt.s32.totalorder %v3964_v50, 2 }
 0xcdf   :  { %v2394_v58 = vor.u32 %v2393_v47, %v2392_v12  ;;  %v2397_v5 = vor.u32 %v2396_v53, %v2395_v49  ;;  %v2400_v7 = vor.u32 %v2399_v56, %v2398_v52  ;;  %v2403_v8 = vor.u32 %v2402_v2, %v2401_v57 }
 0xce0   :  { %1201 = vrot.lane.b32.xlu1 %v3694_v4, %s3323_s11  ;;  %v2406_v60 = vor.u32 %v2405_v9, %v2404_v3  ;;  %v2391_v47 = vshrl.u32 %v3324_v29, %v2390_v38 }
 0xce1   :  { %v2415_v14 = vsel %vm2407_vm5, %v2394_v58, %v2397_v5  ;;  %v2419_v59 = vsel %vm2407_vm5, %v2397_v5, %v2400_v7  ;;  %v2416_v17 = vsel %vm2410_vm6, %v2403_v8, 920167782  ;;  %v2412_v48 = vsel %vm2410_vm6, %v2400_v7, 2102212464 }
 0xce2   :  { %v2420_v4 = vsel %vm2410_vm6, %v2406_v60, 1326507024  ;;  %v2417_v54 = vsel %vm2409_vm8, %v2400_v7, %v2416_v17  ;;  %v2411_v3 = vsel %vm2407_vm5, %v2391_v47, %v2394_v58  ;;  %v2413_v9 = vsel %vm2409_vm8, %v2397_v5, %v2412_v48 }
 0xce3   :  { %v2421_v24 = vsel %vm2409_vm8, %v2403_v8, %v2420_v4  ;;  %v2418_v0 = vsel %vm2408_vm9, %v2415_v14, %v2417_v54  ;;  %v2414_v38 = vsel %vm2408_vm9, %v2411_v3, %v2413_v9 }
 0xce4   :  { %v2422_v22 = vsel %vm2408_vm9, %v2419_v59, %v2421_v24  ;;  %v2448_v25 = vand.u32 65535, %v2418_v0  ;;  %v2449_v26 = vshrl.u32 %v2418_v0, 16  ;;  %v2468_v24 = vmul.u32 %v3979_v62, %v2414_v38 }
 0xce5   :  { %v2426_v13 = vand.u32 65535, %v2422_v22  ;;  %v2427_v61 = vshrl.u32 %v2422_v22, 16 }
 0xce6   :  { %v2451_v15 = vmul.u32 %v2449_v26, %v2424_v23  ;;  %v2452_v46 = vmul.u32 %v2448_v25, %v2425_v10  ;;  %v2450_v16 = vmul.u32 %v2448_v25, %v2424_v23  ;;  %v2453_v35 = vmul.u32 %v2449_v26, %v2425_v10 }
 0xce7   :  { %v2429_v20 = vmul.u32 %v2427_v61, %v2424_v23  ;;  %v2430_v30 = vmul.u32 %v2426_v13, %v2425_v10  ;;  %v2428_v32 = vmul.u32 %v2426_v13, %v2424_v23  ;;  %v2431_v44 = vmul.u32 %v2427_v61, %v2425_v10 }
 0xce8   :  { %v2454_v33 = vshll.u32 %v2451_v15, 16  ;;  %v2456_v6 = vshll.u32 %v2452_v46, 16  ;;  %v2455_v57 = vshrl.u32 %v2451_v15, 16  ;;  %v2457_v60 = vshrl.u32 %v2452_v46, 16 }
 0xce9   :  { %v2432_v19 = vshll.u32 %v2429_v20, 16  ;;  %v2434_v63 = vshll.u32 %v2430_v30, 16  ;;  %v2433_v53 = vshrl.u32 %v2429_v20, 16  ;;  %v2435_v8 = vshrl.u32 %v2430_v30, 16 }
 0xcea   :  { %vm2458_vm11 = vc.u32 %v2450_v16, %v2454_v33  ;;  %v2460_v1 = vadd.s32 %v2454_v33, %v2450_v16 }
 0xceb   :  { %vm2436_vm10 = vc.u32 %v2428_v32, %v2432_v19  ;;  %v2438_v11 = vadd.s32 %v2432_v19, %v2428_v32  ;;  %v2459_v27 = vsel %vm2458_vm11, 1, %v3330_v28  ;;  %vm1204_vm11 = vcmask 779776  }
 0xcec   :  { %v2437_v41 = vsel %vm2436_vm10, 1, %v3330_v28  ;;  %v2461_v49 = vadd.s32 %v2459_v27, %v2453_v35  ;;  %vm2462_vm7 = vc.u32 %v2460_v1, %v2456_v6  ;;  %v2464_v17 = vadd.s32 %v2460_v1, %v2456_v6 }
 0xced   :  { %v2439_v55 = vadd.s32 %v2437_v41, %v2431_v44  ;;  %vm2440_vm12 = vc.u32 %v2438_v11, %v2434_v63  ;;  %v2463_v56 = vsel %vm2462_vm7, 1, %v3330_v28  ;;  %vm2518_vm10 = vweird.f32 %v3956_v18 }
 0xcee   :  { %v2441_v12 = vsel %vm2440_vm12, 1, %v3330_v28  ;;  %v2465_v2 = vadd.s32 %v2463_v56, %v2461_v49 }
 0xcef   :  { %v2443_v52 = vadd.s32 %v2441_v12, %v2439_v55 }
 0xcf0   :  { %v2466_v14 = vadd.s32 %v2465_v2, %v2455_v57 }
 0xcf1   :  { %v2444_v7 = vadd.s32 %v2443_v52, %v2433_v53 }
 0xcf2   :  { %v2467_v4 = vadd.s32 %v2466_v14, %v2457_v60 }
 0xcf3   :  { %v2445_v59 = vadd.s32 %v2444_v7, %v2435_v8 }
 0xcf4   :  { %v2471_v54 = vadd.s32 1, %v2467_v4 }
 0xcf5   :  { %vm2470_vm13 = vc.u32 %v2445_v59, %v2464_v17  ;;  %v2469_v50 = vadd.s32 %v2464_v17, %v2445_v59 }
 0xcf6   :  { %v2472_v0 = vsel %vm2470_vm13, %v2471_v54, %v2467_v4 }
 0xcf7   :  { %v2473_v22 = vadd.s32 %v2472_v0, %v2468_v24 }
 0xcf9   :  { %v2474_v58 = vadd.s32 536870912, %v2473_v22 }
 0xcfb   :  { %v2475_v23 = vshrl.u32 %v2474_v58, 30 }
 0xcfd   :  { %v2476_v10 = vshll.u32 %v2475_v23, 30  ;;  %v2499_v53 = vsub.s32 4, %v2475_v23 }
 0xcff   :  { %v2477_v5 = vsub.s32 %v2473_v22, %v2476_v10  ;;  %v2500_v57 = vsel %vm2377_vm2, %v2499_v53, %v2475_v23 }
 0xd00   :  { %v2502_v3 = vsel %vm2376_vm3, 0, %v2500_v57 }
 0xd01   :  { %vm2478_vm14 = vcmp.lt.s32.totalorder %v2477_v5, 0  ;;  %v2479_v13 = vsub.s32 0, %v2477_v5  ;;  %v2678_v7 = vadd.s32 3, %v2502_v3  ;;  %v2519_v14 = vand.u32 3, %v2502_v3 }
 0xd03   :  { %v2480_v61 = vsel %vm2478_vm14, %v2479_v13, %v2477_v5  ;;  %v2679_v59 = vand.u32 3, %v2678_v7  ;;  %vm2521_vm4 = vcmp.eq.s32.totalorder %v2519_v14, 0  ;;  %vm2524_vm5 = vcmp.eq.s32.totalorder %v2519_v14, 2 }
 0xd04   :  { %v2481_v25 = vclz %v2480_v61  ;;  %vm2520_vm8 = vcmp.lt.s32.totalorder %v2519_v14, 2 }
 0xd05   :  { %vm2681_vm15 = vcmp.eq.s32.totalorder %v2679_v59, 0  ;;  %vm2684_vm6 = vcmp.eq.s32.totalorder %v2679_v59, 2  ;;  %vm2680_vm9 = vcmp.lt.s32.totalorder %v2679_v59, 2 }
 0xd06   :  { %v3141_v26 = vadd.s32 4294967294, %v2481_v25 }
 0xd08   :  { %vm3142_vm1 = vcmp.lt.s32.totalorder %v3141_v26, 0 }
 0xd09   :  { %v2484_v20 = vsel %vm3142_vm1, 0, %v3141_v26 }
 0xd0a   :  { %v2485_v30 = vsub.s32 32, %v2484_v20  ;;  %v2489_v15 = vsub.s32 4294967266, %v2484_v20  ;;  %v2486_v46 = vshll.u32 %v2477_v5, %v2484_v20 }
 0xd0c   :  { %v2487_v32 = vshrl.u32 %v2469_v50, %v2485_v30  ;;  %v2490_v19 = vadd.s32 127, %v2489_v15 }
 0xd0e   :  { %v2488_v62 = vor.u32 %v2487_v32, %v2486_v46  ;;  %v2491_v44 = vshll.u32 %v2490_v19, 23 }
 0xd10   :  { %v2492_v16 = vor.u32 4788187, %v2491_v44  ;;  %v2495_v63 = vcvt.s32.f32 %v2488_v62 }
 0xd12   :  { %v2493_v33 = vand.u32 2147483647, %v2492_v16 }
 0xd14   :  { %v2496_v11 = vmul.f32 %v2495_v63, %v2493_v33 }
 0xd16   :  { %v2497_v35 = vxor.u32 2147483648, %v2496_v11 }
 0xd18   :  { %v2498_v41 = vsel %vm2377_vm2, %v2497_v35, %v2496_v11 }
 0xd19   :  { %v2501_v6 = vsel %vm2376_vm3, %v3956_v18, %v2498_v41 }
 0xd1a   :  { %v2503_v1 = vmul.f32 %v2501_v6, %v2501_v6 }
 0xd1c   :  { %v2511_v55 = vmul.f32 -0.00019511016, %v2503_v1  ;;  %v2504_v48 = vmul.f32 -0.001358992, %v2503_v1 }
 0xd1e   :  { %v2512_v27 = vadd.f32 0.008332121, %v2511_v55  ;;  %v2505_v49 = vadd.f32 0.041655596, %v2504_v48 }
 0xd20   :  { %v2513_v12 = vmul.f32 %v2512_v27, %v2503_v1  ;;  %v2506_v52 = vmul.f32 %v2505_v49, %v2503_v1 }
 0xd22   :  { %v2514_v47 = vadd.f32 -0.16666654, %v2513_v12  ;;  %v2507_v2 = vadd.f32 -0.4999988, %v2506_v52 }
 0xd24   :  { %v2515_v56 = vmul.f32 %v2514_v47, %v2503_v1  ;;  %v2508_v8 = vmul.f32 %v2507_v2, %v2503_v1 }
 0xd26   :  { %v2516_v9 = vadd.f32 1.0, %v2515_v56  ;;  %v2509_v21 = vadd.f32 1.0, %v2508_v8 }
 0xd28   :  { %v2517_v60 = vmul.f32 %v2516_v9, %v2501_v6  ;;  %v2525_v38 = vxor.u32 2147483648, %v2509_v21 }
 0xd2a   :  { %v2522_v17 = vxor.u32 2147483648, %v2517_v60  ;;  %v2526_v24 = vsel %vm2524_vm5, %v2525_v38, %v2517_v60  ;;  %v2686_v0 = vsel %vm2684_vm6, %v2525_v38, %v2517_v60 }
 0xd2c   :  { %v2523_v4 = vsel %vm2521_vm4, %v2509_v21, %v2522_v17  ;;  %v2683_v54 = vsel %vm2681_vm15, %v2509_v21, %v2522_v17 }
 0xd2d   :  { %v2527_v22 = vsel %vm2520_vm8, %v2523_v4, %v2526_v24  ;;  %v2687_v58 = vsel %vm2680_vm9, %v2683_v54, %v2686_v0 }
 0xd2e   :  { %v2528_v23 = vsel %vm2518_vm10, nan, %v2527_v22  ;;  %v2688_v10 = vsel %vm2518_vm10, nan, %v2687_v58 }
 0xd4a   :  { %v2531_v5 = vpop.permute.xlu1 %2530 }
 0xd4b   :  { %v2533_v13 = vmul.f32 %v2531_v5, %v2528_v23  ;;  %v2689_v61 = vmul.f32 %v2688_v10, %v2531_v5 }
 0xd4d   :  { %v2690_v25 = vmul.f32 %v2533_v13, %v3933_v42  ;;  %v2691_v26 = vmul.f32 %v2689_v61, %v3940_v36 }
 0xd4f   :  { %v4023_v20 = vadd.f32 %v2691_v26, %v2690_v25 }
 0xd51   :  { %2698 = vrot.lane.b32.xlu2 %v4023_v20, %s3331_s12 }
 0xd52   :  { %v1202_v50 = vpop.permute.xlu1 %1201 }
 0xd53   :  { %1205 = vst.msk [vmem:[#allocation8] sm:$0x3] %vm1204_vm11, %v1202_v50 }
 0xd59   :  { %2694 = vrot.lane.b32.xlu2 %v4023_v20, %s3323_s11 }
 0xdab   :  { %v2699_v18 = vpop.permute.xlu2 %2698 }
 0xdac   :  { %3146 = vmatmul.msk.f32.vlgmr.msrb.gmra.mxu2 %vm83_vm0, %v2699_v18 }
 0xdb3   :  { %v2695_v30 = vpop.permute.xlu2 %2694 }
 0xdb4   :  { %2697 = vst.msk [vmem:[#allocation8 + $0x2] sm:$0x3] %vm1204_vm11, %v2695_v30 }
 0xe2f   :  { %v4030_v15 = vpop.f32.mrf.mxu2 }
 0xe30   :  { %v2722_v42 = vadd.f32 %v3945_v51, %v4030_v15 }
 0xe32   :  { %3200 = vtanh.f32 %v2722_v42 }
 0xe38   :  { %v3201_v36 = vpop.eup %3200 }
 0xe39   :  { %3147 = vmatmul.msk.f32.vlgmr.msrb.gmra.mxu3 %vm83_vm0, %v3201_v36 }
 0xebc   :  { %v2744_v46 = vpop.f32.mrf.mxu3 }
 0xebd   :  { %v4036_v32 = vadd.f32 %v3953_v45, %v2744_v46 }
 0xebf   :  { %v2752_v19 = vand.u32 2139095040, %v4036_v32  ;;  %v2747_v62 = vmul.f32 1.442695, %v4036_v32  ;;  %v2749_v33 = vand.u32 2147483647, %v4036_v32  ;;  %vm2751_vm8 = vcmp.lt.s32.totalorder %v4036_v32, 0 }
 0xec1   :  { %v2753_v44 = vshrl.u32 %v2752_v19, 23  ;;  %3202 = vpow2.f32 %v2747_v62  ;;  %v2756_v35 = vand.u32 8388607, %v2749_v33  ;;  %vm2750_vm9 = vcmp.le.f32.partialorder %v2749_v33, 0.7853982 }
 0xec3   :  { %v3148_v16 = vadd.s32 4294967169, %v2753_v44  ;;  %v2757_v1 = vor.u32 8388608, %v2756_v35 }
 0xec5   :  { %v2759_v63 = vadd.s32 1, %v3148_v16 }
 0xec7   :  { %v3203_v11 = vpop.eup %3202  ;;  %vm2760_vm12 = vcmp.gt.s32.totalorder %v2759_v63, 0 }
 0xec8   :  { %v2761_v51 = vsel %vm2760_vm12, %v2759_v63, 0  ;;  %2904 = vrot.lane.b32.xlu0 %v3203_v11, %s3323_s11 }
 0xec9   :  { %v2763_v45 = vand.u32 31, %v2761_v51  ;;  %v4046_v6 = vshrl.u32 %v2761_v51, 5 }
 0xecb   :  { %v4044_v41 = vsub.s32 32, %v2763_v45  ;;  %v2766_v55 = vshll.u32 %v3324_v29, %v2763_v45  ;;  %v2769_v27 = vshll.u32 %v3325_v31, %v2763_v45  ;;  %v2772_v49 = vshll.u32 %v3326_v34, %v2763_v45 }
 0xecc   :  { %v2775_v53 = vshll.u32 %v3327_v37, %v2763_v45  ;;  %v2778_v56 = vshll.u32 %v3328_v40, %v2763_v45  ;;  %vm2781_vm0 = vcmp.lt.s32.totalorder %v4046_v6, 1  ;;  %vm2784_vm7 = vcmp.lt.s32.totalorder %v4046_v6, 4 }
 0xecd   :  { %v2767_v48 = vshrl.u32 %v3325_v31, %v4044_v41  ;;  %v2770_v12 = vshrl.u32 %v3326_v34, %v4044_v41  ;;  %v2773_v47 = vshrl.u32 %v3327_v37, %v4044_v41  ;;  %v2776_v52 = vshrl.u32 %v3328_v40, %v4044_v41 }
 0xece   :  { %v2779_v57 = vshrl.u32 %v3329_v43, %v4044_v41  ;;  %v4066_v37 = vshll.u32 %v2757_v1, 8  ;;  %vm2783_vm13 = vcmp.lt.s32.totalorder %v4046_v6, 3  ;;  %vm2782_vm14 = vcmp.lt.s32.totalorder %v4046_v6, 2 }
 0xecf   :  { %v2768_v2 = vor.u32 %v2767_v48, %v2766_v55  ;;  %v2771_v31 = vor.u32 %v2770_v12, %v2769_v27  ;;  %v2774_v3 = vor.u32 %v2773_v47, %v2772_v49  ;;  %v2777_v34 = vor.u32 %v2776_v52, %v2775_v53 }
 0xed0   :  { %1576 = vrot.lane.b32.xlu0 %v3780_v39, %s3332_s2  ;;  %v2780_v9 = vor.u32 %v2779_v57, %v2778_v56  ;;  %v2798_v59 = vand.u32 65535, %v4066_v37  ;;  %v2799_v17 = vshrl.u32 %v4066_v37, 16  ;;  %v2765_v63 = vshrl.u32 %v3324_v29, %v4044_v41 }
 0xed1   :  { %v2789_v40 = vsel %vm2781_vm0, %v2768_v2, %v2771_v31  ;;  %v2793_v43 = vsel %vm2781_vm0, %v2771_v31, %v2774_v3  ;;  %v2790_v8 = vsel %vm2784_vm7, %v2777_v34, 920167782  ;;  %v2786_v62 = vsel %vm2784_vm7, %v2774_v3, 2102212464 }
 0xed2   :  { %v2794_v39 = vsel %vm2784_vm7, %v2780_v9, 1326507024  ;;  %v2791_v7 = vsel %vm2783_vm13, %v2774_v3, %v2790_v8  ;;  %v2785_v55 = vsel %vm2781_vm0, %v2765_v63, %v2768_v2  ;;  %v2787_v27 = vsel %vm2783_vm13, %v2771_v31, %v2786_v62 }
 0xed3   :  { %v2795_v60 = vsel %vm2783_vm13, %v2777_v34, %v2794_v39  ;;  %v2792_v21 = vsel %vm2782_vm14, %v2789_v40, %v2791_v7  ;;  %v2788_v29 = vsel %vm2782_vm14, %v2785_v55, %v2787_v27 }
 0xed4   :  { %v2796_v14 = vsel %vm2782_vm14, %v2793_v43, %v2795_v60  ;;  %v2822_v54 = vand.u32 65535, %v2792_v21  ;;  %v2823_v24 = vshrl.u32 %v2792_v21, 16  ;;  %v2842_v56 = vmul.u32 %v4066_v37, %v2788_v29 }
 0xed5   :  { %v2800_v38 = vand.u32 65535, %v2796_v14  ;;  %v2801_v4 = vshrl.u32 %v2796_v14, 16  ;;  %vm2892_vm14 = vweird.f32 %v4036_v32 }
 0xed6   :  { %v2825_v58 = vmul.u32 %v2823_v24, %v2798_v59  ;;  %v2826_v23 = vmul.u32 %v2822_v54, %v2799_v17  ;;  %v2824_v61 = vmul.u32 %v2822_v54, %v2798_v59  ;;  %v2827_v18 = vmul.u32 %v2823_v24, %v2799_v17 }
 0xed7   :  { %v2803_v0 = vmul.u32 %v2801_v4, %v2798_v59  ;;  %v2804_v22 = vmul.u32 %v2800_v38, %v2799_v17  ;;  %v2802_v10 = vmul.u32 %v2800_v38, %v2798_v59  ;;  %v2805_v13 = vmul.u32 %v2801_v4, %v2799_v17 }
 0xed8   :  { %v2828_v25 = vshll.u32 %v2825_v58, 16  ;;  %v2830_v42 = vshll.u32 %v2826_v23, 16  ;;  %v2829_v45 = vshrl.u32 %v2825_v58, 16  ;;  %v2831_v49 = vshrl.u32 %v2826_v23, 16 }
 0xed9   :  { %v2806_v5 = vshll.u32 %v2803_v0, 16  ;;  %v2808_v26 = vshll.u32 %v2804_v22, 16  ;;  %v2807_v11 = vshrl.u32 %v2803_v0, 16  ;;  %v2809_v48 = vshrl.u32 %v2804_v22, 16 }
 0xeda   :  { %vm2832_vm2 = vc.u32 %v2824_v61, %v2828_v25  ;;  %v2834_v36 = vadd.s32 %v2828_v25, %v2824_v61 }
 0xedb   :  { %vm2810_vm1 = vc.u32 %v2802_v10, %v2806_v5  ;;  %v2812_v50 = vadd.s32 %v2806_v5, %v2802_v10  ;;  %v2833_v19 = vsel %vm2832_vm2, 1, %v3330_v28 }
 0xedc   :  { %v2811_v30 = vsel %vm2810_vm1, 1, %v3330_v28  ;;  %v2835_v16 = vadd.s32 %v2833_v19, %v2827_v18  ;;  %vm2836_vm4 = vc.u32 %v2834_v36, %v2830_v42  ;;  %v2838_v52 = vadd.s32 %v2834_v36, %v2830_v42 }
 0xedd   :  { %v2813_v46 = vadd.s32 %v2811_v30, %v2805_v13  ;;  %vm2814_vm3 = vc.u32 %v2812_v50, %v2808_v26  ;;  %v2837_v35 = vsel %vm2836_vm4, 1, %v3330_v28  ;;  %vm1579_vm1 = vcmask 1042176  }
 0xede   :  { %v2815_v44 = vsel %vm2814_vm3, 1, %v3330_v28  ;;  %v2839_v1 = vadd.s32 %v2837_v35, %v2835_v16 }
 0xedf   :  { %v2817_v51 = vadd.s32 %v2815_v44, %v2813_v46 }
 0xee0   :  { %v2840_v47 = vadd.s32 %v2839_v1, %v2829_v45 }
 0xee1   :  { %v2818_v12 = vadd.s32 %v2817_v51, %v2807_v11 }
 0xee2   :  { %v2841_v41 = vadd.s32 %v2840_v47, %v2831_v49 }
 0xee3   :  { %v2819_v53 = vadd.s32 %v2818_v12, %v2809_v48 }
 0xee4   :  { %v2845_v28 = vadd.s32 1, %v2841_v41 }
 0xee5   :  { %vm2844_vm15 = vc.u32 %v2819_v53, %v2838_v52  ;;  %v2843_v6 = vadd.s32 %v2838_v52, %v2819_v53 }
 0xee6   :  { %v2846_v57 = vsel %vm2844_vm15, %v2845_v28, %v2841_v41 }
 0xee7   :  { %v2847_v3 = vadd.s32 %v2846_v57, %v2842_v56 }
 0xee9   :  { %v2848_v2 = vadd.s32 536870912, %v2847_v3 }
 0xeeb   :  { %v2849_v34 = vshrl.u32 %v2848_v2, 30 }
 0xeed   :  { %v2850_v9 = vshll.u32 %v2849_v34, 30  ;;  %v2873_v18 = vsub.s32 4, %v2849_v34 }
 0xeef   :  { %v2851_v31 = vsub.s32 %v2847_v3, %v2850_v9  ;;  %v2874_v36 = vsel %vm2751_vm8, %v2873_v18, %v2849_v34 }
 0xef0   :  { %v2876_v19 = vsel %vm2750_vm9, 0, %v2874_v36 }
 0xef1   :  { %vm2852_vm5 = vcmp.lt.s32.totalorder %v2851_v31, 0  ;;  %v2853_v40 = vsub.s32 0, %v2851_v31  ;;  %v3052_v16 = vadd.s32 3, %v2876_v19  ;;  %v2893_v11 = vand.u32 3, %v2876_v19 }
 0xef3   :  { %v2854_v43 = vsel %vm2852_vm5, %v2853_v40, %v2851_v31  ;;  %v3053_v51 = vand.u32 3, %v3052_v16  ;;  %vm2895_vm10 = vcmp.eq.s32.totalorder %v2893_v11, 0  ;;  %vm2898_vm12 = vcmp.eq.s32.totalorder %v2893_v11, 2 }
 0xef4   :  { %v2855_v8 = vclz %v2854_v43  ;;  %vm2894_vm7 = vcmp.lt.s32.totalorder %v2893_v11, 2 }
 0xef5   :  { %vm3055_vm11 = vcmp.eq.s32.totalorder %v3053_v51, 0  ;;  %vm3058_vm0 = vcmp.eq.s32.totalorder %v3053_v51, 2  ;;  %vm3054_vm13 = vcmp.lt.s32.totalorder %v3053_v51, 2 }
 0xef6   :  { %v3149_v39 = vadd.s32 4294967294, %v2855_v8 }
 0xef8   :  { %vm3150_vm6 = vcmp.lt.s32.totalorder %v3149_v39, 0 }
 0xef9   :  { %v2858_v7 = vsel %vm3150_vm6, 0, %v3149_v39 }
 0xefa   :  { %v2859_v60 = vsub.s32 32, %v2858_v7  ;;  %v2863_v21 = vsub.s32 4294967266, %v2858_v7  ;;  %v2860_v14 = vshll.u32 %v2851_v31, %v2858_v7 }
 0xefc   :  { %v2861_v59 = vshrl.u32 %v2843_v6, %v2859_v60  ;;  %v2864_v17 = vadd.s32 127, %v2863_v21 }
 0xefe   :  { %v2862_v37 = vor.u32 %v2861_v59, %v2860_v14  ;;  %v2865_v38 = vshll.u32 %v2864_v17, 23 }
 0xf00   :  { %v2866_v4 = vor.u32 4788187, %v2865_v38  ;;  %v2869_v24 = vcvt.s32.f32 %v2862_v37 }
 0xf02   :  { %v2867_v54 = vand.u32 2147483647, %v2866_v4 }
 0xf04   :  { %v2870_v0 = vmul.f32 %v2869_v24, %v2867_v54 }
 0xf06   :  { %v2871_v22 = vxor.u32 2147483648, %v2870_v0 }
 0xf08   :  { %v2872_v58 = vsel %vm2751_vm8, %v2871_v22, %v2870_v0 }
 0xf09   :  { %v2875_v23 = vsel %vm2750_vm9, %v4036_v32, %v2872_v58 }
 0xf0a   :  { %v2877_v10 = vmul.f32 %v2875_v23, %v2875_v23 }
 0xf0c   :  { %v2885_v5 = vmul.f32 -0.00019511016, %v2877_v10  ;;  %v2878_v61 = vmul.f32 -0.001358992, %v2877_v10 }
 0xf0e   :  { %v2886_v13 = vadd.f32 0.008332121, %v2885_v5  ;;  %v2879_v26 = vadd.f32 0.041655596, %v2878_v61 }
 0xf10   :  { %v2887_v25 = vmul.f32 %v2886_v13, %v2877_v10  ;;  %v2880_v30 = vmul.f32 %v2879_v26, %v2877_v10 }
 0xf12   :  { %v2888_v50 = vadd.f32 -0.16666654, %v2887_v25  ;;  %v2881_v46 = vadd.f32 -0.4999988, %v2880_v30 }
 0xf14   :  { %v2889_v42 = vmul.f32 %v2888_v50, %v2877_v10  ;;  %v2882_v44 = vmul.f32 %v2881_v46, %v2877_v10 }
 0xf16   :  { %v2890_v62 = vadd.f32 1.0, %v2889_v42  ;;  %v2883_v33 = vadd.f32 1.0, %v2882_v44 }
 0xf18   :  { %v2891_v63 = vmul.f32 %v2890_v62, %v2875_v23  ;;  %v2899_v45 = vxor.u32 2147483648, %v2883_v33 }
 0xf1a   :  { %v2896_v35 = vxor.u32 2147483648, %v2891_v63  ;;  %v2900_v27 = vsel %vm2898_vm12, %v2899_v45, %v2891_v63  ;;  %v3060_v48 = vsel %vm3058_vm0, %v2899_v45, %v2891_v63 }
 0xf1c   :  { %v2897_v1 = vsel %vm2895_vm10, %v2883_v33, %v2896_v35  ;;  %v3057_v55 = vsel %vm3055_vm11, %v2883_v33, %v2896_v35 }
 0xf1d   :  { %v2901_v12 = vsel %vm2894_vm7, %v2897_v1, %v2900_v27  ;;  %v3061_v49 = vsel %vm3054_vm13, %v3057_v55, %v3060_v48 }
 0xf1e   :  { %v2902_v47 = vsel %vm2892_vm14, nan, %v2901_v12  ;;  %v3062_v53 = vsel %vm2892_vm14, nan, %v3061_v49 }
 0xf3a   :  { %v2905_v52 = vpop.permute.xlu0 %2904 }
 0xf3b   :  { %v2907_v29 = vmul.f32 %v2905_v52, %v2902_v47  ;;  %v3063_v41 = vmul.f32 %v3062_v53, %v2905_v52 }
 0xf3d   :  { %v3064_v28 = vmul.f32 %v2907_v29, %v4023_v20  ;;  %v3065_v56 = vmul.f32 %v3063_v41, %v4030_v15 }
 0xf3f   :  { %v3066_v57 = vadd.f32 %v3065_v56, %v3064_v28 }
 0xf41   :  { %3068 = vrot.lane.b32.xlu1 %v3066_v57, %s3332_s2 }
 0xf42   :  { %v1577_v3 = vpop.permute.xlu0 %1576 }
 0xf43   :  { %1580 = vst.msk [vmem:[#allocation8] sm:$0x3] %vm1579_vm1, %v1577_v3 }
 0xfb3   :  { %v3069_v32 = vpop.permute.xlu1 %3068 }
 0xfb4   :  { %3071 = vst.msk [vmem:[#allocation8 + $0x2] sm:$0x3] %vm1579_vm1, %v3069_v32 }
 0xfb5   :  { %3082 = dma.vmem_to_hbm [thread:$0]  %s3078_s21, 64, %s3080_s24, [#allocation4]  }
 0xfb6   :  { %3316 = dma.done.wait [#allocation4], 64  }
 0xfb7   :  { %3317 = vsyncadd [#allocation4], 4294967232 }
 0xfb8   :  { %3087 = vsyncpa [#allocation3], 1 }
 0xfb9   :  { %3088 = vsyncpa [#allocation6], 1 }
 0xfba   :  { %3089 = vsyncpa [#allocation4], 1 }

</bundles_post_ra>
